<compile_context>
chip_gen: v7x
topology: tpu7x:2x2x1
jax: 0.10.0
libtpu: 0.0.40
codegen_flags: <defaults>
</compile_context>

<pallas_src>
from functools import partial

import jax
import jax.numpy as jnp
from jax.experimental import pallas as pl
from jax.experimental.pallas import tpu as pltpu


def spatial_attention_kernel(x_ref, w_ref, o_ref, pad_ref, *,
                             kernel_size, H, W, bb, bbp, c_chunk):
    K = kernel_size
    P = K // 2
    HW = H * W
    C = x_ref.shape[1]
    PW = pad_ref.shape[-1]           # padded flat width (multiple of 128)
    ROWS = pad_ref.shape[0]          # 2 * bbp
    IS = P * W + P                   # flat offset of interior pixel (0, 0)

    # ---- re-zero only the tiny padding borders (interior is overwritten) ---
    if IS > 0:
        pad_ref[:, pl.ds(0, IS)] = jnp.zeros((ROWS, IS), jnp.float32)
    tail = PW - (IS + HW)
    if tail > 0:
        pad_ref[:, pl.ds(IS + HW, tail)] = jnp.zeros((ROWS, tail), jnp.float32)

    # ---- channel mean / max, vectorized over the bb folded batches ---------
    # f32 accumulation chunked over C: never materializes a full (bb, C, HW)
    # f32 copy of the slab.
    inv_c = jnp.float32(1.0 / C)
    acc_sum = jnp.zeros((bb, HW), jnp.float32)
    acc_max = None
    for c0 in range(0, C, c_chunk):
        cs = min(c_chunk, C - c0)
        chunk = x_ref[:, pl.ds(c0, cs), :]                    # (bb, cs, HW) native
        acc_sum = acc_sum + jnp.sum(chunk.astype(jnp.float32), axis=1)
        cmax = jnp.max(chunk, axis=1)                         # native dtype
        acc_max = cmax if acc_max is None else jnp.maximum(acc_max, cmax)

    # Scratch layout: rows [0, bb) = avg, rows [bbp, bbp+bb) = max, each row a
    # flattened (H, W) interior surrounded by zero padding.
    pad_ref[pl.ds(0, bb), pl.ds(IS, HW)] = acc_sum * inv_c
    pad_ref[pl.ds(bbp, bb), pl.ds(IS, HW)] = acc_max.astype(jnp.float32)

    # ---- KxK "SAME" conv, 2 -> 1 channels, no bias, in the flat layout -----
    # Tap (di, dj) == lane slice at IS + di*W + dj (static); rows outside
    # [0, H) hit the zero padding; column wrap is masked once per dj.
    jj = jax.lax.broadcasted_iota(jnp.int32, (bb, HW), 1) % W
    acc = jnp.zeros((bb, HW), jnp.float32)
    for dj in range(-P, P + 1):
        part = jnp.zeros((bb, HW), jnp.float32)
        for c in range(2):
            base = c * bbp
            for di in range(-P, P + 1):
                w_s = w_ref[c * K * K + (di + P) * K + (dj + P)]
                s = IS + di * W + dj                          # static, >= 0
                part = part + w_s * pad_ref[pl.ds(base, bb), pl.ds(s, HW)]
        valid = jnp.logical_and(jj + dj >= 0, jj + dj < W)
        acc = acc + jnp.where(valid, part, jnp.float32(0.0))

    attn = jax.nn.sigmoid(acc).astype(o_ref.dtype)            # (bb, HW)

    # ---- re-weight: x * attn, lane-dense native-dtype load/store -----------
    for b in range(bb):
        o_ref[b] = x_ref[b] * attn[b:b + 1, :]


def spatial_attention(x, w, kernel_size=7):
    """x: (B, C, H, W) float; w: (1, 2, K, K) float (OIHW, bias-free)."""
    B, C, H, W = x.shape
    K = kernel_size
    P = K // 2
    HW = H * W

    # Free reshape (contiguous trailing dims) -> lane-dense last dim.
    x2 = x.reshape(B, C, HW)
    w_flat = w.reshape(-1).astype(jnp.float32)                # (2*K*K,) scalars

    # Greedy batch fold: large-ish per-step slabs (memory-bound kernel) but
    #  (a) <= 8 batches -> full sublane packing in the conv phase,
    #  (b) block <= ~6 MiB so 4*block + scratch + f32 temporaries stays well
    #      under v7x's 64 MiB/TC VMEM,
    #  (c) >= 2 grid steps when B >= 2 so v7x's two TensorCores both work.
    per_b = C * HW * x.dtype.itemsize
    bb = max(1, min(8, B, (6 << 20) // per_b))
    if B >= 2:
        bb = max(1, min(bb, B // 2))
    grid = (pl.cdiv(B, bb),)                                  # partial last block OK

    # Padded flat scratch width (multiple of 128 lanes) and sublane-aligned
    # per-channel row stride.
    PW = ((H + 2 * P) * W + 2 * P + 127) // 128 * 128
    BBP = (bb + 7) // 8 * 8
    c_chunk = max(1, min(C, 32))

    # Estimated live VMEM: double-buffered in+out blocks + scratch + f32 temps.
    scratch_bytes = 2 * BBP * PW * 4
    temp_bytes = (6 * bb * HW + bb * c_chunk * HW) * 4
    need = 4 * bb * per_b + scratch_bytes + temp_bytes

    # Always set an explicit scoped-VMEM limit: v5e's default scope is 16 MiB;
    # stay <= ~48 MiB so v7x (64 MiB/TC physical) keeps headroom.
    # TODO(synk): blocks needing > ~40 MiB should switch to a C-tiled two-pass
    # kernel; until then let v5e/v6e (128 MiB VMEM) absorb them.
    vmem_limit = max(need + (8 << 20), 24 << 20)
    vmem_limit = int(min(vmem_limit,
                         (48 << 20) if need <= (36 << 20) else (100 << 20)))

    kernel = partial(spatial_attention_kernel, kernel_size=K, H=H, W=W,
                     bb=bb, bbp=BBP, c_chunk=c_chunk)

    out = pl.pallas_call(
        kernel,
        out_shape=jax.ShapeDtypeStruct((B, C, HW), x.dtype),
        grid=grid,
        in_specs=[
            pl.BlockSpec((bb, C, HW), lambda i: (i, 0, 0)),
            pl.BlockSpec(memory_space=pltpu.SMEM),            # conv weights (scalars)
        ],
        out_specs=pl.BlockSpec((bb, C, HW), lambda i: (i, 0, 0)),
        scratch_shapes=[
            pltpu.VMEM((2 * BBP, PW), jnp.float32),           # padded [avg|max] rows
        ],
        compiler_params=pltpu.CompilerParams(
            dimension_semantics=("parallel",),
            vmem_limit_bytes=vmem_limit,
        ),
    )(x2, w_flat)

    return out.reshape(B, C, H, W)


def spatial_attention_reference(x, w):
    """Pure-JAX reference matching the PyTorch forward."""
    avg = jnp.mean(x, axis=1, keepdims=True)
    mx = jnp.max(x, axis=1, keepdims=True)
    feat = jnp.concatenate([avg, mx], axis=1)
    conv = jax.lax.conv_general_dilated(
        feat, w, window_strides=(1, 1), padding="SAME",
        dimension_numbers=("NCHW", "OIHW", "NCHW"))
    return x * jax.nn.sigmoid(conv)


if __name__ == "__main__":
    B, C, H, W = 2, 4, 16, 16
    K = 7

    key = jax.random.PRNGKey(0)
    kx, kw = jax.random.split(key)
    x = jax.random.normal(kx, (B, C, H, W), dtype=jnp.float32)
    # Deterministic conv weight, shape (out=1, in=2, K, K), no bias.
    w = jax.random.normal(kw, (1, 2, K, K), dtype=jnp.float32) * 0.05

    out = jax.block_until_ready(spatial_attention(x, w, kernel_size=K))

    ref = spatial_attention_reference(x, w)
    assert out.shape == (B, C, H, W)
    assert jnp.allclose(out, ref, atol=1e-5, rtol=1e-5), float(
        jnp.max(jnp.abs(out - ref)))

    print("KERNEL_OK")
</pallas_src>

<mosaic_0001>
module attributes {stable_mosaic.version = 11 : i64} {
  func.func @spatial_attention_kernel(%arg0: i32, %arg1: memref<1x4x256xf32, #tpu.memory_space<vmem>>, %arg2: memref<98xf32, #tpu.memory_space<smem>>, %arg3: memref<1x4x256xf32, #tpu.memory_space<vmem>>, %arg4: memref<16x384xf32, #tpu.memory_space<vmem>>) attributes {dimension_semantics = [#tpu.dimension_semantics<parallel>], iteration_bounds = array<i64: 2>, scalar_prefetch = 0 : i64, scratch_operands = 1 : i64, tpu.core_type = #tpu.core_type<tc>, window_params = [{transform_indices = @transform_0, window_bounds = array<i64: 1, 4, 256>}, {transform_indices = @transform_1, window_bounds = array<i64: 98>}, {transform_indices = @transform_2, window_bounds = array<i64: 1, 4, 256>}]} {
    %cst = arith.constant 0.000000e+00 : f32
    %0 = vector.broadcast %cst : f32 to vector<16x51xf32>
    %c0 = arith.constant 0 : index
    %c0_0 = arith.constant 0 : index
    %1 = vector.load %arg4[%c0, %c0_0] : memref<16x384xf32, #tpu.memory_space<vmem>>, vector<16x51xf32>
    tpu.vector_store %arg4[%c0, %c0_0], %0 {strides = array<i32>} : memref<16x384xf32, #tpu.memory_space<vmem>>, vector<16x51xf32>,
    %cst_1 = arith.constant 0.000000e+00 : f32
    %2 = vector.broadcast %cst_1 : f32 to vector<16x77xf32>
    %c0_2 = arith.constant 0 : index
    %c307 = arith.constant 307 : index
    %3 = vector.load %arg4[%c0_2, %c307] : memref<16x384xf32, #tpu.memory_space<vmem>>, vector<16x77xf32>
    tpu.vector_store %arg4[%c0_2, %c307], %2 {strides = array<i32>} : memref<16x384xf32, #tpu.memory_space<vmem>>, vector<16x77xf32>,
    %cst_3 = arith.constant 0.000000e+00 : f32
    %4 = vector.broadcast %cst_3 : f32 to vector<1x256xf32>
    %c0_4 = arith.constant 0 : index
    %c0_5 = arith.constant 0 : index
    %c0_6 = arith.constant 0 : index
    %5 = vector.load %arg1[%c0_4, %c0_5, %c0_6] : memref<1x4x256xf32, #tpu.memory_space<vmem>>, vector<1x4x256xf32>
    %cst_7 = arith.constant dense<0.000000e+00> : vector<1x256xf32>
    %6 = vector.multi_reduction <add>, %5, %cst_7 [1] : vector<1x4x256xf32> to vector<1x256xf32>
    %7 = arith.addf %4, %6 : vector<1x256xf32>
    %cst_8 = arith.constant dense<0xFF800000> : vector<1x256xf32>
    %8 = vector.multi_reduction <maximumf>, %5, %cst_8 [1] : vector<1x4x256xf32> to vector<1x256xf32>
    %cst_9 = arith.constant 2.500000e-01 : f32
    %9 = vector.broadcast %cst_9 : f32 to vector<1x256xf32>
    %10 = arith.mulf %7, %9 : vector<1x256xf32>
    %c0_10 = arith.constant 0 : index
    %c51 = arith.constant 51 : index
    %11 = vector.load %arg4[%c0_10, %c51] : memref<16x384xf32, #tpu.memory_space<vmem>>, vector<1x256xf32>
    tpu.vector_store %arg4[%c0_10, %c51], %10 {strides = array<i32>} : memref<16x384xf32, #tpu.memory_space<vmem>>, vector<1x256xf32>,
    %c8 = arith.constant 8 : index
    %c51_11 = arith.constant 51 : index
    %12 = vector.load %arg4[%c8, %c51_11] : memref<16x384xf32, #tpu.memory_space<vmem>>, vector<1x256xf32>
    tpu.vector_store %arg4[%c8, %c51_11], %8 {strides = array<i32>} : memref<16x384xf32, #tpu.memory_space<vmem>>, vector<1x256xf32>,
    %13 = tpu.iota {dimensions = array<i32: 1>} : vector<1x256xi32>
    %c16_i32 = arith.constant 16 : i32
    %c0_i32 = arith.constant 0 : i32
    %14 = arith.cmpi eq, %c16_i32, %c0_i32 : i32
    %c1_i32 = arith.constant 1 : i32
    %15 = arith.select %14, %c1_i32, %c16_i32 : i32
    %16 = vector.broadcast %15 : i32 to vector<1x256xi32>
    %17 = arith.remsi %13, %16 : vector<1x256xi32>
    %c0_i32_12 = arith.constant 0 : i32
    %18 = vector.broadcast %c0_i32_12 : i32 to vector<1x256xi32>
    %19 = arith.cmpi ne, %17, %18 : vector<1x256xi32>
    %c0_i32_13 = arith.constant 0 : i32
    %20 = vector.broadcast %c0_i32_13 : i32 to vector<1x256xi32>
    %21 = arith.cmpi slt, %17, %20 : vector<1x256xi32>
    %c0_i32_14 = arith.constant 0 : i32
    %22 = arith.cmpi slt, %15, %c0_i32_14 : i32
    %23 = vector.broadcast %22 : i1 to vector<1x256xi1>
    %24 = vector.broadcast %23 : vector<1x256xi1> to vector<1x256xi1>
    %25 = arith.xori %21, %24 : vector<1x256xi1>
    %26 = arith.andi %25, %19 : vector<1x256xi1>
    %27 = vector.broadcast %15 : i32 to vector<1x256xi32>
    %28 = arith.addi %17, %27 : vector<1x256xi32>
    %29 = arith.select %26, %28, %17 : vector<1x256xi1>, vector<1x256xi32>
    %cst_15 = arith.constant 0.000000e+00 : f32
    %30 = vector.broadcast %cst_15 : f32 to vector<1x256xf32>
    %cst_16 = arith.constant 0.000000e+00 : f32
    %31 = vector.broadcast %cst_16 : f32 to vector<1x256xf32>
    %c0_17 = arith.constant 0 : index
    %32 = memref.load %arg2[%c0_17] : memref<98xf32, #tpu.memory_space<smem>>
    %c0_18 = arith.constant 0 : index
    %c0_19 = arith.constant 0 : index
    %33 = vector.load %arg4[%c0_18, %c0_19] : memref<16x384xf32, #tpu.memory_space<vmem>>, vector<1x256xf32>
    %34 = vector.broadcast %32 : f32 to vector<1x256xf32>
    %35 = arith.mulf %34, %33 : vector<1x256xf32>
    %36 = arith.addf %31, %35 : vector<1x256xf32>
    %c7 = arith.constant 7 : index
    %37 = memref.load %arg2[%c7] : memref<98xf32, #tpu.memory_space<smem>>
    %c0_20 = arith.constant 0 : index
    %c16 = arith.constant 16 : index
    %38 = vector.load %arg4[%c0_20, %c16] : memref<16x384xf32, #tpu.memory_space<vmem>>, vector<1x256xf32>
    %39 = vector.broadcast %37 : f32 to vector<1x256xf32>
    %40 = arith.mulf %39, %38 : vector<1x256xf32>
    %41 = arith.addf %36, %40 : vector<1x256xf32>
    %c14 = arith.constant 14 : index
    %42 = memref.load %arg2[%c14] : memref<98xf32, #tpu.memory_space<smem>>
    %c0_21 = arith.constant 0 : index
    %c32 = arith.constant 32 : index
    %43 = vector.load %arg4[%c0_21, %c32] : memref<16x384xf32, #tpu.memory_space<vmem>>, vector<1x256xf32>
    %44 = vector.broadcast %42 : f32 to vector<1x256xf32>
    %45 = arith.mulf %44, %43 : vector<1x256xf32>
    %46 = arith.addf %41, %45 : vector<1x256xf32>
    %c21 = arith.constant 21 : index
    %47 = memref.load %arg2[%c21] : memref<98xf32, #tpu.memory_space<smem>>
    %c0_22 = arith.constant 0 : index
    %c48 = arith.constant 48 : index
    %48 = vector.load %arg4[%c0_22, %c48] : memref<16x384xf32, #tpu.memory_space<vmem>>, vector<1x256xf32>
    %49 = vector.broadcast %47 : f32 to vector<1x256xf32>
    %50 = arith.mulf %49, %48 : vector<1x256xf32>
    %51 = arith.addf %46, %50 : vector<1x256xf32>
    %c28 = arith.constant 28 : index
    %52 = memref.load %arg2[%c28] : memref<98xf32, #tpu.memory_space<smem>>
    %c0_23 = arith.constant 0 : index
    %c64 = arith.constant 64 : index
    %53 = vector.load %arg4[%c0_23, %c64] : memref<16x384xf32, #tpu.memory_space<vmem>>, vector<1x256xf32>
    %54 = vector.broadcast %52 : f32 to vector<1x256xf32>
    %55 = arith.mulf %54, %53 : vector<1x256xf32>
    %56 = arith.addf %51, %55 : vector<1x256xf32>
    %c35 = arith.constant 35 : index
    %57 = memref.load %arg2[%c35] : memref<98xf32, #tpu.memory_space<smem>>
    %c0_24 = arith.constant 0 : index
    %c80 = arith.constant 80 : index
    %58 = vector.load %arg4[%c0_24, %c80] : memref<16x384xf32, #tpu.memory_space<vmem>>, vector<1x256xf32>
    %59 = vector.broadcast %57 : f32 to vector<1x256xf32>
    %60 = arith.mulf %59, %58 : vector<1x256xf32>
    %61 = arith.addf %56, %60 : vector<1x256xf32>
    %c42 = arith.constant 42 : index
    %62 = memref.load %arg2[%c42] : memref<98xf32, #tpu.memory_space<smem>>
    %c0_25 = arith.constant 0 : index
    %c96 = arith.constant 96 : index
    %63 = vector.load %arg4[%c0_25, %c96] : memref<16x384xf32, #tpu.memory_space<vmem>>, vector<1x256xf32>
    %64 = vector.broadcast %62 : f32 to vector<1x256xf32>
    %65 = arith.mulf %64, %63 : vector<1x256xf32>
    %66 = arith.addf %61, %65 : vector<1x256xf32>
    %c49 = arith.constant 49 : index
    %67 = memref.load %arg2[%c49] : memref<98xf32, #tpu.memory_space<smem>>
    %c8_26 = arith.constant 8 : index
    %c0_27 = arith.constant 0 : index
    %68 = vector.load %arg4[%c8_26, %c0_27] : memref<16x384xf32, #tpu.memory_space<vmem>>, vector<1x256xf32>
    %69 = vector.broadcast %67 : f32 to vector<1x256xf32>
    %70 = arith.mulf %69, %68 : vector<1x256xf32>
    %71 = arith.addf %66, %70 : vector<1x256xf32>
    %c56 = arith.constant 56 : index
    %72 = memref.load %arg2[%c56] : memref<98xf32, #tpu.memory_space<smem>>
    %c8_28 = arith.constant 8 : index
    %c16_29 = arith.constant 16 : index
    %73 = vector.load %arg4[%c8_28, %c16_29] : memref<16x384xf32, #tpu.memory_space<vmem>>, vector<1x256xf32>
    %74 = vector.broadcast %72 : f32 to vector<1x256xf32>
    %75 = arith.mulf %74, %73 : vector<1x256xf32>
    %76 = arith.addf %71, %75 : vector<1x256xf32>
    %c63 = arith.constant 63 : index
    %77 = memref.load %arg2[%c63] : memref<98xf32, #tpu.memory_space<smem>>
    %c8_30 = arith.constant 8 : index
    %c32_31 = arith.constant 32 : index
    %78 = vector.load %arg4[%c8_30, %c32_31] : memref<16x384xf32, #tpu.memory_space<vmem>>, vector<1x256xf32>
    %79 = vector.broadcast %77 : f32 to vector<1x256xf32>
    %80 = arith.mulf %79, %78 : vector<1x256xf32>
    %81 = arith.addf %76, %80 : vector<1x256xf32>
    %c70 = arith.constant 70 : index
    %82 = memref.load %arg2[%c70] : memref<98xf32, #tpu.memory_space<smem>>
    %c8_32 = arith.constant 8 : index
    %c48_33 = arith.constant 48 : index
    %83 = vector.load %arg4[%c8_32, %c48_33] : memref<16x384xf32, #tpu.memory_space<vmem>>, vector<1x256xf32>
    %84 = vector.broadcast %82 : f32 to vector<1x256xf32>
    %85 = arith.mulf %84, %83 : vector<1x256xf32>
    %86 = arith.addf %81, %85 : vector<1x256xf32>
    %c77 = arith.constant 77 : index
    %87 = memref.load %arg2[%c77] : memref<98xf32, #tpu.memory_space<smem>>
    %c8_34 = arith.constant 8 : index
    %c64_35 = arith.constant 64 : index
    %88 = vector.load %arg4[%c8_34, %c64_35] : memref<16x384xf32, #tpu.memory_space<vmem>>, vector<1x256xf32>
    %89 = vector.broadcast %87 : f32 to vector<1x256xf32>
    %90 = arith.mulf %89, %88 : vector<1x256xf32>
    %91 = arith.addf %86, %90 : vector<1x256xf32>
    %c84 = arith.constant 84 : index
    %92 = memref.load %arg2[%c84] : memref<98xf32, #tpu.memory_space<smem>>
    %c8_36 = arith.constant 8 : index
    %c80_37 = arith.constant 80 : index
    %93 = vector.load %arg4[%c8_36, %c80_37] : memref<16x384xf32, #tpu.memory_space<vmem>>, vector<1x256xf32>
    %94 = vector.broadcast %92 : f32 to vector<1x256xf32>
    %95 = arith.mulf %94, %93 : vector<1x256xf32>
    %96 = arith.addf %91, %95 : vector<1x256xf32>
    %c91 = arith.constant 91 : index
    %97 = memref.load %arg2[%c91] : memref<98xf32, #tpu.memory_space<smem>>
    %c8_38 = arith.constant 8 : index
    %c96_39 = arith.constant 96 : index
    %98 = vector.load %arg4[%c8_38, %c96_39] : memref<16x384xf32, #tpu.memory_space<vmem>>, vector<1x256xf32>
    %99 = vector.broadcast %97 : f32 to vector<1x256xf32>
    %100 = arith.mulf %99, %98 : vector<1x256xf32>
    %101 = arith.addf %96, %100 : vector<1x256xf32>
    %c-3_i32 = arith.constant -3 : i32
    %102 = vector.broadcast %c-3_i32 : i32 to vector<1x256xi32>
    %103 = arith.addi %29, %102 : vector<1x256xi32>
    %c0_i32_40 = arith.constant 0 : i32
    %104 = vector.broadcast %c0_i32_40 : i32 to vector<1x256xi32>
    %105 = arith.cmpi sge, %103, %104 : vector<1x256xi32>
    %c-3_i32_41 = arith.constant -3 : i32
    %106 = vector.broadcast %c-3_i32_41 : i32 to vector<1x256xi32>
    %107 = arith.addi %29, %106 : vector<1x256xi32>
    %c16_i32_42 = arith.constant 16 : i32
    %108 = vector.broadcast %c16_i32_42 : i32 to vector<1x256xi32>
    %109 = arith.cmpi slt, %107, %108 : vector<1x256xi32>
    %110 = arith.andi %105, %109 : vector<1x256xi1>
    %cst_43 = arith.constant 0.000000e+00 : f32
    %111 = vector.broadcast %cst_43 : f32 to vector<1x256xf32>
    %112 = arith.select %110, %101, %111 : vector<1x256xi1>, vector<1x256xf32>
    %113 = arith.addf %30, %112 : vector<1x256xf32>
    %cst_44 = arith.constant 0.000000e+00 : f32
    %114 = vector.broadcast %cst_44 : f32 to vector<1x256xf32>
    %c1 = arith.constant 1 : index
    %115 = memref.load %arg2[%c1] : memref<98xf32, #tpu.memory_space<smem>>
    %c0_45 = arith.constant 0 : index
    %c1_46 = arith.constant 1 : index
    %116 = vector.load %arg4[%c0_45, %c1_46] : memref<16x384xf32, #tpu.memory_space<vmem>>, vector<1x256xf32>
    %117 = vector.broadcast %115 : f32 to vector<1x256xf32>
    %118 = arith.mulf %117, %116 : vector<1x256xf32>
    %119 = arith.addf %114, %118 : vector<1x256xf32>
    %c8_47 = arith.constant 8 : index
    %120 = memref.load %arg2[%c8_47] : memref<98xf32, #tpu.memory_space<smem>>
    %c0_48 = arith.constant 0 : index
    %c17 = arith.constant 17 : index
    %121 = vector.load %arg4[%c0_48, %c17] : memref<16x384xf32, #tpu.memory_space<vmem>>, vector<1x256xf32>
    %122 = vector.broadcast %120 : f32 to vector<1x256xf32>
    %123 = arith.mulf %122, %121 : vector<1x256xf32>
    %124 = arith.addf %119, %123 : vector<1x256xf32>
    %c15 = arith.constant 15 : index
    %125 = memref.load %arg2[%c15] : memref<98xf32, #tpu.memory_space<smem>>
    %c0_49 = arith.constant 0 : index
    %c33 = arith.constant 33 : index
    %126 = vector.load %arg4[%c0_49, %c33] : memref<16x384xf32, #tpu.memory_space<vmem>>, vector<1x256xf32>
    %127 = vector.broadcast %125 : f32 to vector<1x256xf32>
    %128 = arith.mulf %127, %126 : vector<1x256xf32>
    %129 = arith.addf %124, %128 : vector<1x256xf32>
    %c22 = arith.constant 22 : index
    %130 = memref.load %arg2[%c22] : memref<98xf32, #tpu.memory_space<smem>>
    %c0_50 = arith.constant 0 : index
    %c49_51 = arith.constant 49 : index
    %131 = vector.load %arg4[%c0_50, %c49_51] : memref<16x384xf32, #tpu.memory_space<vmem>>, vector<1x256xf32>
    %132 = vector.broadcast %130 : f32 to vector<1x256xf32>
    %133 = arith.mulf %132, %131 : vector<1x256xf32>
    %134 = arith.addf %129, %133 : vector<1x256xf32>
    %c29 = arith.constant 29 : index
    %135 = memref.load %arg2[%c29] : memref<98xf32, #tpu.memory_space<smem>>
    %c0_52 = arith.constant 0 : index
    %c65 = arith.constant 65 : index
    %136 = vector.load %arg4[%c0_52, %c65] : memref<16x384xf32, #tpu.memory_space<vmem>>, vector<1x256xf32>
    %137 = vector.broadcast %135 : f32 to vector<1x256xf32>
    %138 = arith.mulf %137, %136 : vector<1x256xf32>
    %139 = arith.addf %134, %138 : vector<1x256xf32>
    %c36 = arith.constant 36 : index
    %140 = memref.load %arg2[%c36] : memref<98xf32, #tpu.memory_space<smem>>
    %c0_53 = arith.constant 0 : index
    %c81 = arith.constant 81 : index
    %141 = vector.load %arg4[%c0_53, %c81] : memref<16x384xf32, #tpu.memory_space<vmem>>, vector<1x256xf32>
    %142 = vector.broadcast %140 : f32 to vector<1x256xf32>
    %143 = arith.mulf %142, %141 : vector<1x256xf32>
    %144 = arith.addf %139, %143 : vector<1x256xf32>
    %c43 = arith.constant 43 : index
    %145 = memref.load %arg2[%c43] : memref<98xf32, #tpu.memory_space<smem>>
    %c0_54 = arith.constant 0 : index
    %c97 = arith.constant 97 : index
    %146 = vector.load %arg4[%c0_54, %c97] : memref<16x384xf32, #tpu.memory_space<vmem>>, vector<1x256xf32>
    %147 = vector.broadcast %145 : f32 to vector<1x256xf32>
    %148 = arith.mulf %147, %146 : vector<1x256xf32>
    %149 = arith.addf %144, %148 : vector<1x256xf32>
    %c50 = arith.constant 50 : index
    %150 = memref.load %arg2[%c50] : memref<98xf32, #tpu.memory_space<smem>>
    %c8_55 = arith.constant 8 : index
    %c1_56 = arith.constant 1 : index
    %151 = vector.load %arg4[%c8_55, %c1_56] : memref<16x384xf32, #tpu.memory_space<vmem>>, vector<1x256xf32>
    %152 = vector.broadcast %150 : f32 to vector<1x256xf32>
    %153 = arith.mulf %152, %151 : vector<1x256xf32>
    %154 = arith.addf %149, %153 : vector<1x256xf32>
    %c57 = arith.constant 57 : index
    %155 = memref.load %arg2[%c57] : memref<98xf32, #tpu.memory_space<smem>>
    %c8_57 = arith.constant 8 : index
    %c17_58 = arith.constant 17 : index
    %156 = vector.load %arg4[%c8_57, %c17_58] : memref<16x384xf32, #tpu.memory_space<vmem>>, vector<1x256xf32>
    %157 = vector.broadcast %155 : f32 to vector<1x256xf32>
    %158 = arith.mulf %157, %156 : vector<1x256xf32>
    %159 = arith.addf %154, %158 : vector<1x256xf32>
    %c64_59 = arith.constant 64 : index
    %160 = memref.load %arg2[%c64_59] : memref<98xf32, #tpu.memory_space<smem>>
    %c8_60 = arith.constant 8 : index
    %c33_61 = arith.constant 33 : index
    %161 = vector.load %arg4[%c8_60, %c33_61] : memref<16x384xf32, #tpu.memory_space<vmem>>, vector<1x256xf32>
    %162 = vector.broadcast %160 : f32 to vector<1x256xf32>
    %163 = arith.mulf %162, %161 : vector<1x256xf32>
    %164 = arith.addf %159, %163 : vector<1x256xf32>
    %c71 = arith.constant 71 : index
    %165 = memref.load %arg2[%c71] : memref<98xf32, #tpu.memory_space<smem>>
    %c8_62 = arith.constant 8 : index
    %c49_63 = arith.constant 49 : index
    %166 = vector.load %arg4[%c8_62, %c49_63] : memref<16x384xf32, #tpu.memory_space<vmem>>, vector<1x256xf32>
    %167 = vector.broadcast %165 : f32 to vector<1x256xf32>
    %168 = arith.mulf %167, %166 : vector<1x256xf32>
    %169 = arith.addf %164, %168 : vector<1x256xf32>
    %c78 = arith.constant 78 : index
    %170 = memref.load %arg2[%c78] : memref<98xf32, #tpu.memory_space<smem>>
    %c8_64 = arith.constant 8 : index
    %c65_65 = arith.constant 65 : index
    %171 = vector.load %arg4[%c8_64, %c65_65] : memref<16x384xf32, #tpu.memory_space<vmem>>, vector<1x256xf32>
    %172 = vector.broadcast %170 : f32 to vector<1x256xf32>
    %173 = arith.mulf %172, %171 : vector<1x256xf32>
    %174 = arith.addf %169, %173 : vector<1x256xf32>
    %c85 = arith.constant 85 : index
    %175 = memref.load %arg2[%c85] : memref<98xf32, #tpu.memory_space<smem>>
    %c8_66 = arith.constant 8 : index
    %c81_67 = arith.constant 81 : index
    %176 = vector.load %arg4[%c8_66, %c81_67] : memref<16x384xf32, #tpu.memory_space<vmem>>, vector<1x256xf32>
    %177 = vector.broadcast %175 : f32 to vector<1x256xf32>
    %178 = arith.mulf %177, %176 : vector<1x256xf32>
    %179 = arith.addf %174, %178 : vector<1x256xf32>
    %c92 = arith.constant 92 : index
    %180 = memref.load %arg2[%c92] : memref<98xf32, #tpu.memory_space<smem>>
    %c8_68 = arith.constant 8 : index
    %c97_69 = arith.constant 97 : index
    %181 = vector.load %arg4[%c8_68, %c97_69] : memref<16x384xf32, #tpu.memory_space<vmem>>, vector<1x256xf32>
    %182 = vector.broadcast %180 : f32 to vector<1x256xf32>
    %183 = arith.mulf %182, %181 : vector<1x256xf32>
    %184 = arith.addf %179, %183 : vector<1x256xf32>
    %c-2_i32 = arith.constant -2 : i32
    %185 = vector.broadcast %c-2_i32 : i32 to vector<1x256xi32>
    %186 = arith.addi %29, %185 : vector<1x256xi32>
    %c0_i32_70 = arith.constant 0 : i32
    %187 = vector.broadcast %c0_i32_70 : i32 to vector<1x256xi32>
    %188 = arith.cmpi sge, %186, %187 : vector<1x256xi32>
    %c-2_i32_71 = arith.constant -2 : i32
    %189 = vector.broadcast %c-2_i32_71 : i32 to vector<1x256xi32>
    %190 = arith.addi %29, %189 : vector<1x256xi32>
    %c16_i32_72 = arith.constant 16 : i32
    %191 = vector.broadcast %c16_i32_72 : i32 to vector<1x256xi32>
    %192 = arith.cmpi slt, %190, %191 : vector<1x256xi32>
    %193 = arith.andi %188, %192 : vector<1x256xi1>
    %cst_73 = arith.constant 0.000000e+00 : f32
    %194 = vector.broadcast %cst_73 : f32 to vector<1x256xf32>
    %195 = arith.select %193, %184, %194 : vector<1x256xi1>, vector<1x256xf32>
    %196 = arith.addf %113, %195 : vector<1x256xf32>
    %cst_74 = arith.constant 0.000000e+00 : f32
    %197 = vector.broadcast %cst_74 : f32 to vector<1x256xf32>
    %c2 = arith.constant 2 : index
    %198 = memref.load %arg2[%c2] : memref<98xf32, #tpu.memory_space<smem>>
    %c0_75 = arith.constant 0 : index
    %c2_76 = arith.constant 2 : index
    %199 = vector.load %arg4[%c0_75, %c2_76] : memref<16x384xf32, #tpu.memory_space<vmem>>, vector<1x256xf32>
    %200 = vector.broadcast %198 : f32 to vector<1x256xf32>
    %201 = arith.mulf %200, %199 : vector<1x256xf32>
    %202 = arith.addf %197, %201 : vector<1x256xf32>
    %c9 = arith.constant 9 : index
    %203 = memref.load %arg2[%c9] : memref<98xf32, #tpu.memory_space<smem>>
    %c0_77 = arith.constant 0 : index
    %c18 = arith.constant 18 : index
    %204 = vector.load %arg4[%c0_77, %c18] : memref<16x384xf32, #tpu.memory_space<vmem>>, vector<1x256xf32>
    %205 = vector.broadcast %203 : f32 to vector<1x256xf32>
    %206 = arith.mulf %205, %204 : vector<1x256xf32>
    %207 = arith.addf %202, %206 : vector<1x256xf32>
    %c16_78 = arith.constant 16 : index
    %208 = memref.load %arg2[%c16_78] : memref<98xf32, #tpu.memory_space<smem>>
    %c0_79 = arith.constant 0 : index
    %c34 = arith.constant 34 : index
    %209 = vector.load %arg4[%c0_79, %c34] : memref<16x384xf32, #tpu.memory_space<vmem>>, vector<1x256xf32>
    %210 = vector.broadcast %208 : f32 to vector<1x256xf32>
    %211 = arith.mulf %210, %209 : vector<1x256xf32>
    %212 = arith.addf %207, %211 : vector<1x256xf32>
    %c23 = arith.constant 23 : index
    %213 = memref.load %arg2[%c23] : memref<98xf32, #tpu.memory_space<smem>>
    %c0_80 = arith.constant 0 : index
    %c50_81 = arith.constant 50 : index
    %214 = vector.load %arg4[%c0_80, %c50_81] : memref<16x384xf32, #tpu.memory_space<vmem>>, vector<1x256xf32>
    %215 = vector.broadcast %213 : f32 to vector<1x256xf32>
    %216 = arith.mulf %215, %214 : vector<1x256xf32>
    %217 = arith.addf %212, %216 : vector<1x256xf32>
    %c30 = arith.constant 30 : index
    %218 = memref.load %arg2[%c30] : memref<98xf32, #tpu.memory_space<smem>>
    %c0_82 = arith.constant 0 : index
    %c66 = arith.constant 66 : index
    %219 = vector.load %arg4[%c0_82, %c66] : memref<16x384xf32, #tpu.memory_space<vmem>>, vector<1x256xf32>
    %220 = vector.broadcast %218 : f32 to vector<1x256xf32>
    %221 = arith.mulf %220, %219 : vector<1x256xf32>
    %222 = arith.addf %217, %221 : vector<1x256xf32>
    %c37 = arith.constant 37 : index
    %223 = memref.load %arg2[%c37] : memref<98xf32, #tpu.memory_space<smem>>
    %c0_83 = arith.constant 0 : index
    %c82 = arith.constant 82 : index
    %224 = vector.load %arg4[%c0_83, %c82] : memref<16x384xf32, #tpu.memory_space<vmem>>, vector<1x256xf32>
    %225 = vector.broadcast %223 : f32 to vector<1x256xf32>
    %226 = arith.mulf %225, %224 : vector<1x256xf32>
    %227 = arith.addf %222, %226 : vector<1x256xf32>
    %c44 = arith.constant 44 : index
    %228 = memref.load %arg2[%c44] : memref<98xf32, #tpu.memory_space<smem>>
    %c0_84 = arith.constant 0 : index
    %c98 = arith.constant 98 : index
    %229 = vector.load %arg4[%c0_84, %c98] : memref<16x384xf32, #tpu.memory_space<vmem>>, vector<1x256xf32>
    %230 = vector.broadcast %228 : f32 to vector<1x256xf32>
    %231 = arith.mulf %230, %229 : vector<1x256xf32>
    %232 = arith.addf %227, %231 : vector<1x256xf32>
    %c51_85 = arith.constant 51 : index
    %233 = memref.load %arg2[%c51_85] : memref<98xf32, #tpu.memory_space<smem>>
    %c8_86 = arith.constant 8 : index
    %c2_87 = arith.constant 2 : index
    %234 = vector.load %arg4[%c8_86, %c2_87] : memref<16x384xf32, #tpu.memory_space<vmem>>, vector<1x256xf32>
    %235 = vector.broadcast %233 : f32 to vector<1x256xf32>
    %236 = arith.mulf %235, %234 : vector<1x256xf32>
    %237 = arith.addf %232, %236 : vector<1x256xf32>
    %c58 = arith.constant 58 : index
    %238 = memref.load %arg2[%c58] : memref<98xf32, #tpu.memory_space<smem>>
    %c8_88 = arith.constant 8 : index
    %c18_89 = arith.constant 18 : index
    %239 = vector.load %arg4[%c8_88, %c18_89] : memref<16x384xf32, #tpu.memory_space<vmem>>, vector<1x256xf32>
    %240 = vector.broadcast %238 : f32 to vector<1x256xf32>
    %241 = arith.mulf %240, %239 : vector<1x256xf32>
    %242 = arith.addf %237, %241 : vector<1x256xf32>
    %c65_90 = arith.constant 65 : index
    %243 = memref.load %arg2[%c65_90] : memref<98xf32, #tpu.memory_space<smem>>
    %c8_91 = arith.constant 8 : index
    %c34_92 = arith.constant 34 : index
    %244 = vector.load %arg4[%c8_91, %c34_92] : memref<16x384xf32, #tpu.memory_space<vmem>>, vector<1x256xf32>
    %245 = vector.broadcast %243 : f32 to vector<1x256xf32>
    %246 = arith.mulf %245, %244 : vector<1x256xf32>
    %247 = arith.addf %242, %246 : vector<1x256xf32>
    %c72 = arith.constant 72 : index
    %248 = memref.load %arg2[%c72] : memref<98xf32, #tpu.memory_space<smem>>
    %c8_93 = arith.constant 8 : index
    %c50_94 = arith.constant 50 : index
    %249 = vector.load %arg4[%c8_93, %c50_94] : memref<16x384xf32, #tpu.memory_space<vmem>>, vector<1x256xf32>
    %250 = vector.broadcast %248 : f32 to vector<1x256xf32>
    %251 = arith.mulf %250, %249 : vector<1x256xf32>
    %252 = arith.addf %247, %251 : vector<1x256xf32>
    %c79 = arith.constant 79 : index
    %253 = memref.load %arg2[%c79] : memref<98xf32, #tpu.memory_space<smem>>
    %c8_95 = arith.constant 8 : index
    %c66_96 = arith.constant 66 : index
    %254 = vector.load %arg4[%c8_95, %c66_96] : memref<16x384xf32, #tpu.memory_space<vmem>>, vector<1x256xf32>
    %255 = vector.broadcast %253 : f32 to vector<1x256xf32>
    %256 = arith.mulf %255, %254 : vector<1x256xf32>
    %257 = arith.addf %252, %256 : vector<1x256xf32>
    %c86 = arith.constant 86 : index
    %258 = memref.load %arg2[%c86] : memref<98xf32, #tpu.memory_space<smem>>
    %c8_97 = arith.constant 8 : index
    %c82_98 = arith.constant 82 : index
    %259 = vector.load %arg4[%c8_97, %c82_98] : memref<16x384xf32, #tpu.memory_space<vmem>>, vector<1x256xf32>
    %260 = vector.broadcast %258 : f32 to vector<1x256xf32>
    %261 = arith.mulf %260, %259 : vector<1x256xf32>
    %262 = arith.addf %257, %261 : vector<1x256xf32>
    %c93 = arith.constant 93 : index
    %263 = memref.load %arg2[%c93] : memref<98xf32, #tpu.memory_space<smem>>
    %c8_99 = arith.constant 8 : index
    %c98_100 = arith.constant 98 : index
    %264 = vector.load %arg4[%c8_99, %c98_100] : memref<16x384xf32, #tpu.memory_space<vmem>>, vector<1x256xf32>
    %265 = vector.broadcast %263 : f32 to vector<1x256xf32>
    %266 = arith.mulf %265, %264 : vector<1x256xf32>
    %267 = arith.addf %262, %266 : vector<1x256xf32>
    %c-1_i32 = arith.constant -1 : i32
    %268 = vector.broadcast %c-1_i32 : i32 to vector<1x256xi32>
    %269 = arith.addi %29, %268 : vector<1x256xi32>
    %c0_i32_101 = arith.constant 0 : i32
    %270 = vector.broadcast %c0_i32_101 : i32 to vector<1x256xi32>
    %271 = arith.cmpi sge, %269, %270 : vector<1x256xi32>
    %c-1_i32_102 = arith.constant -1 : i32
    %272 = vector.broadcast %c-1_i32_102 : i32 to vector<1x256xi32>
    %273 = arith.addi %29, %272 : vector<1x256xi32>
    %c16_i32_103 = arith.constant 16 : i32
    %274 = vector.broadcast %c16_i32_103 : i32 to vector<1x256xi32>
    %275 = arith.cmpi slt, %273, %274 : vector<1x256xi32>
    %276 = arith.andi %271, %275 : vector<1x256xi1>
    %cst_104 = arith.constant 0.000000e+00 : f32
    %277 = vector.broadcast %cst_104 : f32 to vector<1x256xf32>
    %278 = arith.select %276, %267, %277 : vector<1x256xi1>, vector<1x256xf32>
    %279 = arith.addf %196, %278 : vector<1x256xf32>
    %cst_105 = arith.constant 0.000000e+00 : f32
    %280 = vector.broadcast %cst_105 : f32 to vector<1x256xf32>
    %c3 = arith.constant 3 : index
    %281 = memref.load %arg2[%c3] : memref<98xf32, #tpu.memory_space<smem>>
    %c0_106 = arith.constant 0 : index
    %c3_107 = arith.constant 3 : index
    %282 = vector.load %arg4[%c0_106, %c3_107] : memref<16x384xf32, #tpu.memory_space<vmem>>, vector<1x256xf32>
    %283 = vector.broadcast %281 : f32 to vector<1x256xf32>
    %284 = arith.mulf %283, %282 : vector<1x256xf32>
    %285 = arith.addf %280, %284 : vector<1x256xf32>
    %c10 = arith.constant 10 : index
    %286 = memref.load %arg2[%c10] : memref<98xf32, #tpu.memory_space<smem>>
    %c0_108 = arith.constant 0 : index
    %c19 = arith.constant 19 : index
    %287 = vector.load %arg4[%c0_108, %c19] : memref<16x384xf32, #tpu.memory_space<vmem>>, vector<1x256xf32>
    %288 = vector.broadcast %286 : f32 to vector<1x256xf32>
    %289 = arith.mulf %288, %287 : vector<1x256xf32>
    %290 = arith.addf %285, %289 : vector<1x256xf32>
    %c17_109 = arith.constant 17 : index
    %291 = memref.load %arg2[%c17_109] : memref<98xf32, #tpu.memory_space<smem>>
    %c0_110 = arith.constant 0 : index
    %c35_111 = arith.constant 35 : index
    %292 = vector.load %arg4[%c0_110, %c35_111] : memref<16x384xf32, #tpu.memory_space<vmem>>, vector<1x256xf32>
    %293 = vector.broadcast %291 : f32 to vector<1x256xf32>
    %294 = arith.mulf %293, %292 : vector<1x256xf32>
    %295 = arith.addf %290, %294 : vector<1x256xf32>
    %c24 = arith.constant 24 : index
    %296 = memref.load %arg2[%c24] : memref<98xf32, #tpu.memory_space<smem>>
    %c0_112 = arith.constant 0 : index
    %c51_113 = arith.constant 51 : index
    %297 = vector.load %arg4[%c0_112, %c51_113] : memref<16x384xf32, #tpu.memory_space<vmem>>, vector<1x256xf32>
    %298 = vector.broadcast %296 : f32 to vector<1x256xf32>
    %299 = arith.mulf %298, %297 : vector<1x256xf32>
    %300 = arith.addf %295, %299 : vector<1x256xf32>
    %c31 = arith.constant 31 : index
    %301 = memref.load %arg2[%c31] : memref<98xf32, #tpu.memory_space<smem>>
    %c0_114 = arith.constant 0 : index
    %c67 = arith.constant 67 : index
    %302 = vector.load %arg4[%c0_114, %c67] : memref<16x384xf32, #tpu.memory_space<vmem>>, vector<1x256xf32>
    %303 = vector.broadcast %301 : f32 to vector<1x256xf32>
    %304 = arith.mulf %303, %302 : vector<1x256xf32>
    %305 = arith.addf %300, %304 : vector<1x256xf32>
    %c38 = arith.constant 38 : index
    %306 = memref.load %arg2[%c38] : memref<98xf32, #tpu.memory_space<smem>>
    %c0_115 = arith.constant 0 : index
    %c83 = arith.constant 83 : index
    %307 = vector.load %arg4[%c0_115, %c83] : memref<16x384xf32, #tpu.memory_space<vmem>>, vector<1x256xf32>
    %308 = vector.broadcast %306 : f32 to vector<1x256xf32>
    %309 = arith.mulf %308, %307 : vector<1x256xf32>
    %310 = arith.addf %305, %309 : vector<1x256xf32>
    %c45 = arith.constant 45 : index
    %311 = memref.load %arg2[%c45] : memref<98xf32, #tpu.memory_space<smem>>
    %c0_116 = arith.constant 0 : index
    %c99 = arith.constant 99 : index
    %312 = vector.load %arg4[%c0_116, %c99] : memref<16x384xf32, #tpu.memory_space<vmem>>, vector<1x256xf32>
    %313 = vector.broadcast %311 : f32 to vector<1x256xf32>
    %314 = arith.mulf %313, %312 : vector<1x256xf32>
    %315 = arith.addf %310, %314 : vector<1x256xf32>
    %c52 = arith.constant 52 : index
    %316 = memref.load %arg2[%c52] : memref<98xf32, #tpu.memory_space<smem>>
    %c8_117 = arith.constant 8 : index
    %c3_118 = arith.constant 3 : index
    %317 = vector.load %arg4[%c8_117, %c3_118] : memref<16x384xf32, #tpu.memory_space<vmem>>, vector<1x256xf32>
    %318 = vector.broadcast %316 : f32 to vector<1x256xf32>
    %319 = arith.mulf %318, %317 : vector<1x256xf32>
    %320 = arith.addf %315, %319 : vector<1x256xf32>
    %c59 = arith.constant 59 : index
    %321 = memref.load %arg2[%c59] : memref<98xf32, #tpu.memory_space<smem>>
    %c8_119 = arith.constant 8 : index
    %c19_120 = arith.constant 19 : index
    %322 = vector.load %arg4[%c8_119, %c19_120] : memref<16x384xf32, #tpu.memory_space<vmem>>, vector<1x256xf32>
    %323 = vector.broadcast %321 : f32 to vector<1x256xf32>
    %324 = arith.mulf %323, %322 : vector<1x256xf32>
    %325 = arith.addf %320, %324 : vector<1x256xf32>
    %c66_121 = arith.constant 66 : index
    %326 = memref.load %arg2[%c66_121] : memref<98xf32, #tpu.memory_space<smem>>
    %c8_122 = arith.constant 8 : index
    %c35_123 = arith.constant 35 : index
    %327 = vector.load %arg4[%c8_122, %c35_123] : memref<16x384xf32, #tpu.memory_space<vmem>>, vector<1x256xf32>
    %328 = vector.broadcast %326 : f32 to vector<1x256xf32>
    %329 = arith.mulf %328, %327 : vector<1x256xf32>
    %330 = arith.addf %325, %329 : vector<1x256xf32>
    %c73 = arith.constant 73 : index
    %331 = memref.load %arg2[%c73] : memref<98xf32, #tpu.memory_space<smem>>
    %c8_124 = arith.constant 8 : index
    %c51_125 = arith.constant 51 : index
    %332 = vector.load %arg4[%c8_124, %c51_125] : memref<16x384xf32, #tpu.memory_space<vmem>>, vector<1x256xf32>
    %333 = vector.broadcast %331 : f32 to vector<1x256xf32>
    %334 = arith.mulf %333, %332 : vector<1x256xf32>
    %335 = arith.addf %330, %334 : vector<1x256xf32>
    %c80_126 = arith.constant 80 : index
    %336 = memref.load %arg2[%c80_126] : memref<98xf32, #tpu.memory_space<smem>>
    %c8_127 = arith.constant 8 : index
    %c67_128 = arith.constant 67 : index
    %337 = vector.load %arg4[%c8_127, %c67_128] : memref<16x384xf32, #tpu.memory_space<vmem>>, vector<1x256xf32>
    %338 = vector.broadcast %336 : f32 to vector<1x256xf32>
    %339 = arith.mulf %338, %337 : vector<1x256xf32>
    %340 = arith.addf %335, %339 : vector<1x256xf32>
    %c87 = arith.constant 87 : index
    %341 = memref.load %arg2[%c87] : memref<98xf32, #tpu.memory_space<smem>>
    %c8_129 = arith.constant 8 : index
    %c83_130 = arith.constant 83 : index
    %342 = vector.load %arg4[%c8_129, %c83_130] : memref<16x384xf32, #tpu.memory_space<vmem>>, vector<1x256xf32>
    %343 = vector.broadcast %341 : f32 to vector<1x256xf32>
    %344 = arith.mulf %343, %342 : vector<1x256xf32>
    %345 = arith.addf %340, %344 : vector<1x256xf32>
    %c94 = arith.constant 94 : index
    %346 = memref.load %arg2[%c94] : memref<98xf32, #tpu.memory_space<smem>>
    %c8_131 = arith.constant 8 : index
    %c99_132 = arith.constant 99 : index
    %347 = vector.load %arg4[%c8_131, %c99_132] : memref<16x384xf32, #tpu.memory_space<vmem>>, vector<1x256xf32>
    %348 = vector.broadcast %346 : f32 to vector<1x256xf32>
    %349 = arith.mulf %348, %347 : vector<1x256xf32>
    %350 = arith.addf %345, %349 : vector<1x256xf32>
    %c0_i32_133 = arith.constant 0 : i32
    %351 = vector.broadcast %c0_i32_133 : i32 to vector<1x256xi32>
    %352 = arith.addi %29, %351 : vector<1x256xi32>
    %c0_i32_134 = arith.constant 0 : i32
    %353 = vector.broadcast %c0_i32_134 : i32 to vector<1x256xi32>
    %354 = arith.cmpi sge, %352, %353 : vector<1x256xi32>
    %c0_i32_135 = arith.constant 0 : i32
    %355 = vector.broadcast %c0_i32_135 : i32 to vector<1x256xi32>
    %356 = arith.addi %29, %355 : vector<1x256xi32>
    %c16_i32_136 = arith.constant 16 : i32
    %357 = vector.broadcast %c16_i32_136 : i32 to vector<1x256xi32>
    %358 = arith.cmpi slt, %356, %357 : vector<1x256xi32>
    %359 = arith.andi %354, %358 : vector<1x256xi1>
    %cst_137 = arith.constant 0.000000e+00 : f32
    %360 = vector.broadcast %cst_137 : f32 to vector<1x256xf32>
    %361 = arith.select %359, %350, %360 : vector<1x256xi1>, vector<1x256xf32>
    %362 = arith.addf %279, %361 : vector<1x256xf32>
    %cst_138 = arith.constant 0.000000e+00 : f32
    %363 = vector.broadcast %cst_138 : f32 to vector<1x256xf32>
    %c4 = arith.constant 4 : index
    %364 = memref.load %arg2[%c4] : memref<98xf32, #tpu.memory_space<smem>>
    %c0_139 = arith.constant 0 : index
    %c4_140 = arith.constant 4 : index
    %365 = vector.load %arg4[%c0_139, %c4_140] : memref<16x384xf32, #tpu.memory_space<vmem>>, vector<1x256xf32>
    %366 = vector.broadcast %364 : f32 to vector<1x256xf32>
    %367 = arith.mulf %366, %365 : vector<1x256xf32>
    %368 = arith.addf %363, %367 : vector<1x256xf32>
    %c11 = arith.constant 11 : index
    %369 = memref.load %arg2[%c11] : memref<98xf32, #tpu.memory_space<smem>>
    %c0_141 = arith.constant 0 : index
    %c20 = arith.constant 20 : index
    %370 = vector.load %arg4[%c0_141, %c20] : memref<16x384xf32, #tpu.memory_space<vmem>>, vector<1x256xf32>
    %371 = vector.broadcast %369 : f32 to vector<1x256xf32>
    %372 = arith.mulf %371, %370 : vector<1x256xf32>
    %373 = arith.addf %368, %372 : vector<1x256xf32>
    %c18_142 = arith.constant 18 : index
    %374 = memref.load %arg2[%c18_142] : memref<98xf32, #tpu.memory_space<smem>>
    %c0_143 = arith.constant 0 : index
    %c36_144 = arith.constant 36 : index
    %375 = vector.load %arg4[%c0_143, %c36_144] : memref<16x384xf32, #tpu.memory_space<vmem>>, vector<1x256xf32>
    %376 = vector.broadcast %374 : f32 to vector<1x256xf32>
    %377 = arith.mulf %376, %375 : vector<1x256xf32>
    %378 = arith.addf %373, %377 : vector<1x256xf32>
    %c25 = arith.constant 25 : index
    %379 = memref.load %arg2[%c25] : memref<98xf32, #tpu.memory_space<smem>>
    %c0_145 = arith.constant 0 : index
    %c52_146 = arith.constant 52 : index
    %380 = vector.load %arg4[%c0_145, %c52_146] : memref<16x384xf32, #tpu.memory_space<vmem>>, vector<1x256xf32>
    %381 = vector.broadcast %379 : f32 to vector<1x256xf32>
    %382 = arith.mulf %381, %380 : vector<1x256xf32>
    %383 = arith.addf %378, %382 : vector<1x256xf32>
    %c32_147 = arith.constant 32 : index
    %384 = memref.load %arg2[%c32_147] : memref<98xf32, #tpu.memory_space<smem>>
    %c0_148 = arith.constant 0 : index
    %c68 = arith.constant 68 : index
    %385 = vector.load %arg4[%c0_148, %c68] : memref<16x384xf32, #tpu.memory_space<vmem>>, vector<1x256xf32>
    %386 = vector.broadcast %384 : f32 to vector<1x256xf32>
    %387 = arith.mulf %386, %385 : vector<1x256xf32>
    %388 = arith.addf %383, %387 : vector<1x256xf32>
    %c39 = arith.constant 39 : index
    %389 = memref.load %arg2[%c39] : memref<98xf32, #tpu.memory_space<smem>>
    %c0_149 = arith.constant 0 : index
    %c84_150 = arith.constant 84 : index
    %390 = vector.load %arg4[%c0_149, %c84_150] : memref<16x384xf32, #tpu.memory_space<vmem>>, vector<1x256xf32>
    %391 = vector.broadcast %389 : f32 to vector<1x256xf32>
    %392 = arith.mulf %391, %390 : vector<1x256xf32>
    %393 = arith.addf %388, %392 : vector<1x256xf32>
    %c46 = arith.constant 46 : index
    %394 = memref.load %arg2[%c46] : memref<98xf32, #tpu.memory_space<smem>>
    %c0_151 = arith.constant 0 : index
    %c100 = arith.constant 100 : index
    %395 = vector.load %arg4[%c0_151, %c100] : memref<16x384xf32, #tpu.memory_space<vmem>>, vector<1x256xf32>
    %396 = vector.broadcast %394 : f32 to vector<1x256xf32>
    %397 = arith.mulf %396, %395 : vector<1x256xf32>
    %398 = arith.addf %393, %397 : vector<1x256xf32>
    %c53 = arith.constant 53 : index
    %399 = memref.load %arg2[%c53] : memref<98xf32, #tpu.memory_space<smem>>
    %c8_152 = arith.constant 8 : index
    %c4_153 = arith.constant 4 : index
    %400 = vector.load %arg4[%c8_152, %c4_153] : memref<16x384xf32, #tpu.memory_space<vmem>>, vector<1x256xf32>
    %401 = vector.broadcast %399 : f32 to vector<1x256xf32>
    %402 = arith.mulf %401, %400 : vector<1x256xf32>
    %403 = arith.addf %398, %402 : vector<1x256xf32>
    %c60 = arith.constant 60 : index
    %404 = memref.load %arg2[%c60] : memref<98xf32, #tpu.memory_space<smem>>
    %c8_154 = arith.constant 8 : index
    %c20_155 = arith.constant 20 : index
    %405 = vector.load %arg4[%c8_154, %c20_155] : memref<16x384xf32, #tpu.memory_space<vmem>>, vector<1x256xf32>
    %406 = vector.broadcast %404 : f32 to vector<1x256xf32>
    %407 = arith.mulf %406, %405 : vector<1x256xf32>
    %408 = arith.addf %403, %407 : vector<1x256xf32>
    %c67_156 = arith.constant 67 : index
    %409 = memref.load %arg2[%c67_156] : memref<98xf32, #tpu.memory_space<smem>>
    %c8_157 = arith.constant 8 : index
    %c36_158 = arith.constant 36 : index
    %410 = vector.load %arg4[%c8_157, %c36_158] : memref<16x384xf32, #tpu.memory_space<vmem>>, vector<1x256xf32>
    %411 = vector.broadcast %409 : f32 to vector<1x256xf32>
    %412 = arith.mulf %411, %410 : vector<1x256xf32>
    %413 = arith.addf %408, %412 : vector<1x256xf32>
    %c74 = arith.constant 74 : index
    %414 = memref.load %arg2[%c74] : memref<98xf32, #tpu.memory_space<smem>>
    %c8_159 = arith.constant 8 : index
    %c52_160 = arith.constant 52 : index
    %415 = vector.load %arg4[%c8_159, %c52_160] : memref<16x384xf32, #tpu.memory_space<vmem>>, vector<1x256xf32>
    %416 = vector.broadcast %414 : f32 to vector<1x256xf32>
    %417 = arith.mulf %416, %415 : vector<1x256xf32>
    %418 = arith.addf %413, %417 : vector<1x256xf32>
    %c81_161 = arith.constant 81 : index
    %419 = memref.load %arg2[%c81_161] : memref<98xf32, #tpu.memory_space<smem>>
    %c8_162 = arith.constant 8 : index
    %c68_163 = arith.constant 68 : index
    %420 = vector.load %arg4[%c8_162, %c68_163] : memref<16x384xf32, #tpu.memory_space<vmem>>, vector<1x256xf32>
    %421 = vector.broadcast %419 : f32 to vector<1x256xf32>
    %422 = arith.mulf %421, %420 : vector<1x256xf32>
    %423 = arith.addf %418, %422 : vector<1x256xf32>
    %c88 = arith.constant 88 : index
    %424 = memref.load %arg2[%c88] : memref<98xf32, #tpu.memory_space<smem>>
    %c8_164 = arith.constant 8 : index
    %c84_165 = arith.constant 84 : index
    %425 = vector.load %arg4[%c8_164, %c84_165] : memref<16x384xf32, #tpu.memory_space<vmem>>, vector<1x256xf32>
    %426 = vector.broadcast %424 : f32 to vector<1x256xf32>
    %427 = arith.mulf %426, %425 : vector<1x256xf32>
    %428 = arith.addf %423, %427 : vector<1x256xf32>
    %c95 = arith.constant 95 : index
    %429 = memref.load %arg2[%c95] : memref<98xf32, #tpu.memory_space<smem>>
    %c8_166 = arith.constant 8 : index
    %c100_167 = arith.constant 100 : index
    %430 = vector.load %arg4[%c8_166, %c100_167] : memref<16x384xf32, #tpu.memory_space<vmem>>, vector<1x256xf32>
    %431 = vector.broadcast %429 : f32 to vector<1x256xf32>
    %432 = arith.mulf %431, %430 : vector<1x256xf32>
    %433 = arith.addf %428, %432 : vector<1x256xf32>
    %c1_i32_168 = arith.constant 1 : i32
    %434 = vector.broadcast %c1_i32_168 : i32 to vector<1x256xi32>
    %435 = arith.addi %29, %434 : vector<1x256xi32>
    %c0_i32_169 = arith.constant 0 : i32
    %436 = vector.broadcast %c0_i32_169 : i32 to vector<1x256xi32>
    %437 = arith.cmpi sge, %435, %436 : vector<1x256xi32>
    %c1_i32_170 = arith.constant 1 : i32
    %438 = vector.broadcast %c1_i32_170 : i32 to vector<1x256xi32>
    %439 = arith.addi %29, %438 : vector<1x256xi32>
    %c16_i32_171 = arith.constant 16 : i32
    %440 = vector.broadcast %c16_i32_171 : i32 to vector<1x256xi32>
    %441 = arith.cmpi slt, %439, %440 : vector<1x256xi32>
    %442 = arith.andi %437, %441 : vector<1x256xi1>
    %cst_172 = arith.constant 0.000000e+00 : f32
    %443 = vector.broadcast %cst_172 : f32 to vector<1x256xf32>
    %444 = arith.select %442, %433, %443 : vector<1x256xi1>, vector<1x256xf32>
    %445 = arith.addf %362, %444 : vector<1x256xf32>
    %cst_173 = arith.constant 0.000000e+00 : f32
    %446 = vector.broadcast %cst_173 : f32 to vector<1x256xf32>
    %c5 = arith.constant 5 : index
    %447 = memref.load %arg2[%c5] : memref<98xf32, #tpu.memory_space<smem>>
    %c0_174 = arith.constant 0 : index
    %c5_175 = arith.constant 5 : index
    %448 = vector.load %arg4[%c0_174, %c5_175] : memref<16x384xf32, #tpu.memory_space<vmem>>, vector<1x256xf32>
    %449 = vector.broadcast %447 : f32 to vector<1x256xf32>
    %450 = arith.mulf %449, %448 : vector<1x256xf32>
    %451 = arith.addf %446, %450 : vector<1x256xf32>
    %c12 = arith.constant 12 : index
    %452 = memref.load %arg2[%c12] : memref<98xf32, #tpu.memory_space<smem>>
    %c0_176 = arith.constant 0 : index
    %c21_177 = arith.constant 21 : index
    %453 = vector.load %arg4[%c0_176, %c21_177] : memref<16x384xf32, #tpu.memory_space<vmem>>, vector<1x256xf32>
    %454 = vector.broadcast %452 : f32 to vector<1x256xf32>
    %455 = arith.mulf %454, %453 : vector<1x256xf32>
    %456 = arith.addf %451, %455 : vector<1x256xf32>
    %c19_178 = arith.constant 19 : index
    %457 = memref.load %arg2[%c19_178] : memref<98xf32, #tpu.memory_space<smem>>
    %c0_179 = arith.constant 0 : index
    %c37_180 = arith.constant 37 : index
    %458 = vector.load %arg4[%c0_179, %c37_180] : memref<16x384xf32, #tpu.memory_space<vmem>>, vector<1x256xf32>
    %459 = vector.broadcast %457 : f32 to vector<1x256xf32>
    %460 = arith.mulf %459, %458 : vector<1x256xf32>
    %461 = arith.addf %456, %460 : vector<1x256xf32>
    %c26 = arith.constant 26 : index
    %462 = memref.load %arg2[%c26] : memref<98xf32, #tpu.memory_space<smem>>
    %c0_181 = arith.constant 0 : index
    %c53_182 = arith.constant 53 : index
    %463 = vector.load %arg4[%c0_181, %c53_182] : memref<16x384xf32, #tpu.memory_space<vmem>>, vector<1x256xf32>
    %464 = vector.broadcast %462 : f32 to vector<1x256xf32>
    %465 = arith.mulf %464, %463 : vector<1x256xf32>
    %466 = arith.addf %461, %465 : vector<1x256xf32>
    %c33_183 = arith.constant 33 : index
    %467 = memref.load %arg2[%c33_183] : memref<98xf32, #tpu.memory_space<smem>>
    %c0_184 = arith.constant 0 : index
    %c69 = arith.constant 69 : index
    %468 = vector.load %arg4[%c0_184, %c69] : memref<16x384xf32, #tpu.memory_space<vmem>>, vector<1x256xf32>
    %469 = vector.broadcast %467 : f32 to vector<1x256xf32>
    %470 = arith.mulf %469, %468 : vector<1x256xf32>
    %471 = arith.addf %466, %470 : vector<1x256xf32>
    %c40 = arith.constant 40 : index
    %472 = memref.load %arg2[%c40] : memref<98xf32, #tpu.memory_space<smem>>
    %c0_185 = arith.constant 0 : index
    %c85_186 = arith.constant 85 : index
    %473 = vector.load %arg4[%c0_185, %c85_186] : memref<16x384xf32, #tpu.memory_space<vmem>>, vector<1x256xf32>
    %474 = vector.broadcast %472 : f32 to vector<1x256xf32>
    %475 = arith.mulf %474, %473 : vector<1x256xf32>
    %476 = arith.addf %471, %475 : vector<1x256xf32>
    %c47 = arith.constant 47 : index
    %477 = memref.load %arg2[%c47] : memref<98xf32, #tpu.memory_space<smem>>
    %c0_187 = arith.constant 0 : index
    %c101 = arith.constant 101 : index
    %478 = vector.load %arg4[%c0_187, %c101] : memref<16x384xf32, #tpu.memory_space<vmem>>, vector<1x256xf32>
    %479 = vector.broadcast %477 : f32 to vector<1x256xf32>
    %480 = arith.mulf %479, %478 : vector<1x256xf32>
    %481 = arith.addf %476, %480 : vector<1x256xf32>
    %c54 = arith.constant 54 : index
    %482 = memref.load %arg2[%c54] : memref<98xf32, #tpu.memory_space<smem>>
    %c8_188 = arith.constant 8 : index
    %c5_189 = arith.constant 5 : index
    %483 = vector.load %arg4[%c8_188, %c5_189] : memref<16x384xf32, #tpu.memory_space<vmem>>, vector<1x256xf32>
    %484 = vector.broadcast %482 : f32 to vector<1x256xf32>
    %485 = arith.mulf %484, %483 : vector<1x256xf32>
    %486 = arith.addf %481, %485 : vector<1x256xf32>
    %c61 = arith.constant 61 : index
    %487 = memref.load %arg2[%c61] : memref<98xf32, #tpu.memory_space<smem>>
    %c8_190 = arith.constant 8 : index
    %c21_191 = arith.constant 21 : index
    %488 = vector.load %arg4[%c8_190, %c21_191] : memref<16x384xf32, #tpu.memory_space<vmem>>, vector<1x256xf32>
    %489 = vector.broadcast %487 : f32 to vector<1x256xf32>
    %490 = arith.mulf %489, %488 : vector<1x256xf32>
    %491 = arith.addf %486, %490 : vector<1x256xf32>
    %c68_192 = arith.constant 68 : index
    %492 = memref.load %arg2[%c68_192] : memref<98xf32, #tpu.memory_space<smem>>
    %c8_193 = arith.constant 8 : index
    %c37_194 = arith.constant 37 : index
    %493 = vector.load %arg4[%c8_193, %c37_194] : memref<16x384xf32, #tpu.memory_space<vmem>>, vector<1x256xf32>
    %494 = vector.broadcast %492 : f32 to vector<1x256xf32>
    %495 = arith.mulf %494, %493 : vector<1x256xf32>
    %496 = arith.addf %491, %495 : vector<1x256xf32>
    %c75 = arith.constant 75 : index
    %497 = memref.load %arg2[%c75] : memref<98xf32, #tpu.memory_space<smem>>
    %c8_195 = arith.constant 8 : index
    %c53_196 = arith.constant 53 : index
    %498 = vector.load %arg4[%c8_195, %c53_196] : memref<16x384xf32, #tpu.memory_space<vmem>>, vector<1x256xf32>
    %499 = vector.broadcast %497 : f32 to vector<1x256xf32>
    %500 = arith.mulf %499, %498 : vector<1x256xf32>
    %501 = arith.addf %496, %500 : vector<1x256xf32>
    %c82_197 = arith.constant 82 : index
    %502 = memref.load %arg2[%c82_197] : memref<98xf32, #tpu.memory_space<smem>>
    %c8_198 = arith.constant 8 : index
    %c69_199 = arith.constant 69 : index
    %503 = vector.load %arg4[%c8_198, %c69_199] : memref<16x384xf32, #tpu.memory_space<vmem>>, vector<1x256xf32>
    %504 = vector.broadcast %502 : f32 to vector<1x256xf32>
    %505 = arith.mulf %504, %503 : vector<1x256xf32>
    %506 = arith.addf %501, %505 : vector<1x256xf32>
    %c89 = arith.constant 89 : index
    %507 = memref.load %arg2[%c89] : memref<98xf32, #tpu.memory_space<smem>>
    %c8_200 = arith.constant 8 : index
    %c85_201 = arith.constant 85 : index
    %508 = vector.load %arg4[%c8_200, %c85_201] : memref<16x384xf32, #tpu.memory_space<vmem>>, vector<1x256xf32>
    %509 = vector.broadcast %507 : f32 to vector<1x256xf32>
    %510 = arith.mulf %509, %508 : vector<1x256xf32>
    %511 = arith.addf %506, %510 : vector<1x256xf32>
    %c96_202 = arith.constant 96 : index
    %512 = memref.load %arg2[%c96_202] : memref<98xf32, #tpu.memory_space<smem>>
    %c8_203 = arith.constant 8 : index
    %c101_204 = arith.constant 101 : index
    %513 = vector.load %arg4[%c8_203, %c101_204] : memref<16x384xf32, #tpu.memory_space<vmem>>, vector<1x256xf32>
    %514 = vector.broadcast %512 : f32 to vector<1x256xf32>
    %515 = arith.mulf %514, %513 : vector<1x256xf32>
    %516 = arith.addf %511, %515 : vector<1x256xf32>
    %c2_i32 = arith.constant 2 : i32
    %517 = vector.broadcast %c2_i32 : i32 to vector<1x256xi32>
    %518 = arith.addi %29, %517 : vector<1x256xi32>
    %c0_i32_205 = arith.constant 0 : i32
    %519 = vector.broadcast %c0_i32_205 : i32 to vector<1x256xi32>
    %520 = arith.cmpi sge, %518, %519 : vector<1x256xi32>
    %c2_i32_206 = arith.constant 2 : i32
    %521 = vector.broadcast %c2_i32_206 : i32 to vector<1x256xi32>
    %522 = arith.addi %29, %521 : vector<1x256xi32>
    %c16_i32_207 = arith.constant 16 : i32
    %523 = vector.broadcast %c16_i32_207 : i32 to vector<1x256xi32>
    %524 = arith.cmpi slt, %522, %523 : vector<1x256xi32>
    %525 = arith.andi %520, %524 : vector<1x256xi1>
    %cst_208 = arith.constant 0.000000e+00 : f32
    %526 = vector.broadcast %cst_208 : f32 to vector<1x256xf32>
    %527 = arith.select %525, %516, %526 : vector<1x256xi1>, vector<1x256xf32>
    %528 = arith.addf %445, %527 : vector<1x256xf32>
    %cst_209 = arith.constant 0.000000e+00 : f32
    %529 = vector.broadcast %cst_209 : f32 to vector<1x256xf32>
    %c6 = arith.constant 6 : index
    %530 = memref.load %arg2[%c6] : memref<98xf32, #tpu.memory_space<smem>>
    %c0_210 = arith.constant 0 : index
    %c6_211 = arith.constant 6 : index
    %531 = vector.load %arg4[%c0_210, %c6_211] : memref<16x384xf32, #tpu.memory_space<vmem>>, vector<1x256xf32>
    %532 = vector.broadcast %530 : f32 to vector<1x256xf32>
    %533 = arith.mulf %532, %531 : vector<1x256xf32>
    %534 = arith.addf %529, %533 : vector<1x256xf32>
    %c13 = arith.constant 13 : index
    %535 = memref.load %arg2[%c13] : memref<98xf32, #tpu.memory_space<smem>>
    %c0_212 = arith.constant 0 : index
    %c22_213 = arith.constant 22 : index
    %536 = vector.load %arg4[%c0_212, %c22_213] : memref<16x384xf32, #tpu.memory_space<vmem>>, vector<1x256xf32>
    %537 = vector.broadcast %535 : f32 to vector<1x256xf32>
    %538 = arith.mulf %537, %536 : vector<1x256xf32>
    %539 = arith.addf %534, %538 : vector<1x256xf32>
    %c20_214 = arith.constant 20 : index
    %540 = memref.load %arg2[%c20_214] : memref<98xf32, #tpu.memory_space<smem>>
    %c0_215 = arith.constant 0 : index
    %c38_216 = arith.constant 38 : index
    %541 = vector.load %arg4[%c0_215, %c38_216] : memref<16x384xf32, #tpu.memory_space<vmem>>, vector<1x256xf32>
    %542 = vector.broadcast %540 : f32 to vector<1x256xf32>
    %543 = arith.mulf %542, %541 : vector<1x256xf32>
    %544 = arith.addf %539, %543 : vector<1x256xf32>
    %c27 = arith.constant 27 : index
    %545 = memref.load %arg2[%c27] : memref<98xf32, #tpu.memory_space<smem>>
    %c0_217 = arith.constant 0 : index
    %c54_218 = arith.constant 54 : index
    %546 = vector.load %arg4[%c0_217, %c54_218] : memref<16x384xf32, #tpu.memory_space<vmem>>, vector<1x256xf32>
    %547 = vector.broadcast %545 : f32 to vector<1x256xf32>
    %548 = arith.mulf %547, %546 : vector<1x256xf32>
    %549 = arith.addf %544, %548 : vector<1x256xf32>
    %c34_219 = arith.constant 34 : index
    %550 = memref.load %arg2[%c34_219] : memref<98xf32, #tpu.memory_space<smem>>
    %c0_220 = arith.constant 0 : index
    %c70_221 = arith.constant 70 : index
    %551 = vector.load %arg4[%c0_220, %c70_221] : memref<16x384xf32, #tpu.memory_space<vmem>>, vector<1x256xf32>
    %552 = vector.broadcast %550 : f32 to vector<1x256xf32>
    %553 = arith.mulf %552, %551 : vector<1x256xf32>
    %554 = arith.addf %549, %553 : vector<1x256xf32>
    %c41 = arith.constant 41 : index
    %555 = memref.load %arg2[%c41] : memref<98xf32, #tpu.memory_space<smem>>
    %c0_222 = arith.constant 0 : index
    %c86_223 = arith.constant 86 : index
    %556 = vector.load %arg4[%c0_222, %c86_223] : memref<16x384xf32, #tpu.memory_space<vmem>>, vector<1x256xf32>
    %557 = vector.broadcast %555 : f32 to vector<1x256xf32>
    %558 = arith.mulf %557, %556 : vector<1x256xf32>
    %559 = arith.addf %554, %558 : vector<1x256xf32>
    %c48_224 = arith.constant 48 : index
    %560 = memref.load %arg2[%c48_224] : memref<98xf32, #tpu.memory_space<smem>>
    %c0_225 = arith.constant 0 : index
    %c102 = arith.constant 102 : index
    %561 = vector.load %arg4[%c0_225, %c102] : memref<16x384xf32, #tpu.memory_space<vmem>>, vector<1x256xf32>
    %562 = vector.broadcast %560 : f32 to vector<1x256xf32>
    %563 = arith.mulf %562, %561 : vector<1x256xf32>
    %564 = arith.addf %559, %563 : vector<1x256xf32>
    %c55 = arith.constant 55 : index
    %565 = memref.load %arg2[%c55] : memref<98xf32, #tpu.memory_space<smem>>
    %c8_226 = arith.constant 8 : index
    %c6_227 = arith.constant 6 : index
    %566 = vector.load %arg4[%c8_226, %c6_227] : memref<16x384xf32, #tpu.memory_space<vmem>>, vector<1x256xf32>
    %567 = vector.broadcast %565 : f32 to vector<1x256xf32>
    %568 = arith.mulf %567, %566 : vector<1x256xf32>
    %569 = arith.addf %564, %568 : vector<1x256xf32>
    %c62 = arith.constant 62 : index
    %570 = memref.load %arg2[%c62] : memref<98xf32, #tpu.memory_space<smem>>
    %c8_228 = arith.constant 8 : index
    %c22_229 = arith.constant 22 : index
    %571 = vector.load %arg4[%c8_228, %c22_229] : memref<16x384xf32, #tpu.memory_space<vmem>>, vector<1x256xf32>
    %572 = vector.broadcast %570 : f32 to vector<1x256xf32>
    %573 = arith.mulf %572, %571 : vector<1x256xf32>
    %574 = arith.addf %569, %573 : vector<1x256xf32>
    %c69_230 = arith.constant 69 : index
    %575 = memref.load %arg2[%c69_230] : memref<98xf32, #tpu.memory_space<smem>>
    %c8_231 = arith.constant 8 : index
    %c38_232 = arith.constant 38 : index
    %576 = vector.load %arg4[%c8_231, %c38_232] : memref<16x384xf32, #tpu.memory_space<vmem>>, vector<1x256xf32>
    %577 = vector.broadcast %575 : f32 to vector<1x256xf32>
    %578 = arith.mulf %577, %576 : vector<1x256xf32>
    %579 = arith.addf %574, %578 : vector<1x256xf32>
    %c76 = arith.constant 76 : index
    %580 = memref.load %arg2[%c76] : memref<98xf32, #tpu.memory_space<smem>>
    %c8_233 = arith.constant 8 : index
    %c54_234 = arith.constant 54 : index
    %581 = vector.load %arg4[%c8_233, %c54_234] : memref<16x384xf32, #tpu.memory_space<vmem>>, vector<1x256xf32>
    %582 = vector.broadcast %580 : f32 to vector<1x256xf32>
    %583 = arith.mulf %582, %581 : vector<1x256xf32>
    %584 = arith.addf %579, %583 : vector<1x256xf32>
    %c83_235 = arith.constant 83 : index
    %585 = memref.load %arg2[%c83_235] : memref<98xf32, #tpu.memory_space<smem>>
    %c8_236 = arith.constant 8 : index
    %c70_237 = arith.constant 70 : index
    %586 = vector.load %arg4[%c8_236, %c70_237] : memref<16x384xf32, #tpu.memory_space<vmem>>, vector<1x256xf32>
    %587 = vector.broadcast %585 : f32 to vector<1x256xf32>
    %588 = arith.mulf %587, %586 : vector<1x256xf32>
    %589 = arith.addf %584, %588 : vector<1x256xf32>
    %c90 = arith.constant 90 : index
    %590 = memref.load %arg2[%c90] : memref<98xf32, #tpu.memory_space<smem>>
    %c8_238 = arith.constant 8 : index
    %c86_239 = arith.constant 86 : index
    %591 = vector.load %arg4[%c8_238, %c86_239] : memref<16x384xf32, #tpu.memory_space<vmem>>, vector<1x256xf32>
    %592 = vector.broadcast %590 : f32 to vector<1x256xf32>
    %593 = arith.mulf %592, %591 : vector<1x256xf32>
    %594 = arith.addf %589, %593 : vector<1x256xf32>
    %c97_240 = arith.constant 97 : index
    %595 = memref.load %arg2[%c97_240] : memref<98xf32, #tpu.memory_space<smem>>
    %c8_241 = arith.constant 8 : index
    %c102_242 = arith.constant 102 : index
    %596 = vector.load %arg4[%c8_241, %c102_242] : memref<16x384xf32, #tpu.memory_space<vmem>>, vector<1x256xf32>
    %597 = vector.broadcast %595 : f32 to vector<1x256xf32>
    %598 = arith.mulf %597, %596 : vector<1x256xf32>
    %599 = arith.addf %594, %598 : vector<1x256xf32>
    %c3_i32 = arith.constant 3 : i32
    %600 = vector.broadcast %c3_i32 : i32 to vector<1x256xi32>
    %601 = arith.addi %29, %600 : vector<1x256xi32>
    %c0_i32_243 = arith.constant 0 : i32
    %602 = vector.broadcast %c0_i32_243 : i32 to vector<1x256xi32>
    %603 = arith.cmpi sge, %601, %602 : vector<1x256xi32>
    %c3_i32_244 = arith.constant 3 : i32
    %604 = vector.broadcast %c3_i32_244 : i32 to vector<1x256xi32>
    %605 = arith.addi %29, %604 : vector<1x256xi32>
    %c16_i32_245 = arith.constant 16 : i32
    %606 = vector.broadcast %c16_i32_245 : i32 to vector<1x256xi32>
    %607 = arith.cmpi slt, %605, %606 : vector<1x256xi32>
    %608 = arith.andi %603, %607 : vector<1x256xi1>
    %cst_246 = arith.constant 0.000000e+00 : f32
    %609 = vector.broadcast %cst_246 : f32 to vector<1x256xf32>
    %610 = arith.select %608, %599, %609 : vector<1x256xi1>, vector<1x256xf32>
    %611 = arith.addf %528, %610 : vector<1x256xf32>
    %612 = arith.negf %611 : vector<1x256xf32>
    %613 = math.exp %612 : vector<1x256xf32>
    %cst_247 = arith.constant 1.000000e+00 : f32
    %614 = vector.broadcast %cst_247 : f32 to vector<1x256xf32>
    %615 = arith.addf %614, %613 : vector<1x256xf32>
    %616 = arith.divf %614, %615 : vector<1x256xf32>
    %c0_248 = arith.constant 0 : index
    %c0_249 = arith.constant 0 : index
    %c0_250 = arith.constant 0 : index
    %617 = vector.load %arg1[%c0_248, %c0_249, %c0_250] : memref<1x4x256xf32, #tpu.memory_space<vmem>>, vector<1x4x256xf32>
    %618 = vector.shape_cast %617 : vector<1x4x256xf32> to vector<4x256xf32>
    %619 = vector.broadcast %616 : vector<1x256xf32> to vector<4x256xf32>
    %620 = arith.mulf %618, %619 : vector<4x256xf32>
    %c0_251 = arith.constant 0 : index
    %c0_252 = arith.constant 0 : index
    %c0_253 = arith.constant 0 : index
    %621 = vector.load %arg3[%c0_251, %c0_252, %c0_253] : memref<1x4x256xf32, #tpu.memory_space<vmem>>, vector<1x4x256xf32>
    %622 = vector.shape_cast %621 : vector<1x4x256xf32> to vector<4x256xf32>
    %623 = vector.shape_cast %620 : vector<4x256xf32> to vector<1x4x256xf32>
    tpu.vector_store %arg3[%c0_251, %c0_252, %c0_253], %623 {strides = array<i32>} : memref<1x4x256xf32, #tpu.memory_space<vmem>>, vector<1x4x256xf32>,
    return
  }
  func.func @transform_0(%arg0: i32) -> (i32, i32, i32) {
    %c0_i32 = arith.constant 0 : i32
    %c0_i32_0 = arith.constant 0 : i32
    %c0_i32_1 = arith.constant 0 : i32
    return %arg0, %c0_i32, %c0_i32_0 : i32, i32, i32
  }
  func.func @transform_1(%arg0: i32) -> i32 {
    %c0_i32 = arith.constant 0 : i32
    %c0_i32_0 = arith.constant 0 : i32
    return %c0_i32 : i32
  }
  func.func @transform_2(%arg0: i32) -> (i32, i32, i32) {
    %c0_i32 = arith.constant 0 : i32
    %c0_i32_0 = arith.constant 0 : i32
    %c0_i32_1 = arith.constant 0 : i32
    return %arg0, %c0_i32, %c0_i32_0 : i32, i32, i32
  }
}

</mosaic_0001>

<bundles_post_ra>
// kernel: tpu_custom_call.1
= control target key start
LH: loop header
LB: loop body
LE: loop exit
PB: predicated region body
PF: predicated region fallthrough
CT: control target
= control target key end

     0   :  { %7 = vsyncpa [#allocation4], 0  ;;  %s2677_s0 = inlined_call_operand.hbm [shape: f32[2,4,256], index: 0, kind: input, shape index: {}]   ;;  %s2678_s1 = inlined_call_operand.vmem [shape: f32[98], index: 1, kind: input, shape index: {}]   ;;  %s2679_s2 = inlined_call_operand.hbm [shape: f32[2,4,256], index: 2, kind: output, shape index: {}]  }
   0x1   :  { %9 = vsyncpa [#allocation4 + $0x1], 0 }
   0x2   :  { %10 = vsyncpa [#allocation6], 0 }
   0x3   :  { %11 = vsyncpa [#allocation5], 0 }
   0x4   :  { %13 = vsyncpa [#allocation5 + $0x1], 0  ;;  %s1914_s9 = smov 0   ;;  %s1916_s10 = smov 0  }
   0x5   :  { %s1918_s11 = smov 0   ;;  %s1920_s12 = smov 0  }
   0x6 LB: > { %s1935_s13 = sadd.s32 4294967295, %s1879_s12   ;;  %s1565_s14 = sadd.s32 4294967294, %s1879_s12   ;;  %s1879_s12 = sphi %s1920_s12, %s2714_s12   ;;  %s1875_s11 = sphi %s1918_s11, %s2713_s11   ;;  %s1871_s10 = sphi %s1916_s10, %s2712_s10   ;;  %s1867_s9 = sphi %s1914_s9, %s2711_s9  }
   0x7   : > { %p39_p0 = scmp.ne.s32.totalorder %s1871_s10, %s1867_s9  ;;  %p2680_p1 = scmp.eq.s32.totalorder %s1935_s13, 0 }
   0x8   : > { %p90_p3 = scmp.eq.s32.totalorder %s1565_s14, 1  ;;  %p1566_p5 = scmp.ge.s32.totalorder %s1879_s12, 1 }
   0x9   : > { %p1944_p4 = por %p2680_p1, %p39_p0  ;;  %p97_p7 = scmp.lt.s32.totalorder %s1879_s12, 3 }
   0xa   : > { %p1949_p6 = por %p90_p3, %p39_p0  ;;  %s110_s19 = sshll.u32 %s2678_s1, 4  ;;  %s111_s19 = int_to_ptr.vmem [resolvable:$true] %s110_s19 }
   0xb   : > { %s2687_s15 = scalar_select %p1944_p4, 1, 0 }
   0xc   : > { %s2688_s16 = scalar_select %p1949_p6, 1, 0 }
   0xd   : > { %p1957_p8 = pnand %p1566_p5, %p97_p7  ;;  %s1965_s21 = sadd.s32 1, %s1879_s12  }
   0xe   : > { %s23_s23 = ssub.s32 %s1879_s12, %s1965_s21  ;;  %s26_s25 = sadd.s32 1, %s1875_s11 }
   0xf   : > { %p1690_p10 = pneg %p1957_p8  ;;  %p1975_p12 = scmp.eq.s32.totalorder %s23_s23, 0 }
  0x10   : > { %p33_p13 = scmp.ne.s32.totalorder %s1875_s11, %s1871_s10  ;;  %s1764_s26 = scalar_lea.vmem %s111_s19, 16 }
  0x11   : > { %p1969_p11 = pnand %p1690_p10, %p2680_p1  ;;  %p1765_p0 = scmp.ne.s32.totalorder %s111_s19, %s1764_s26 }
  0x12   : > { %p1772_p9 = scmp.lt.s32.totalorder %s111_s19, %s111_s19  ;;  %p1773_p2 = scmp.lt.s32.totalorder %s1764_s26, %s1764_s26 }
  0x13   : > { %p1766_p3 = pneg %p1969_p11 }
  0x14   : > { %p1774_p10 = por %p1773_p2, %p1772_p9 }
  0x15   : > { %p1767_p5 = pnand %p1766_p3, %p1765_p0 }
  0x17   : > { %p1768_p7 = pneg %p1767_p5 }
  0x19   : > { %p1775_p1 = pnand %p1774_p10, %p1768_p7 }
  0x1b   : > { %1778 = shalt.err (!%p1775_p1)
}
  0x1c   : > { %s1881_s27 = smov [#allocation7]   ;;  %p34_p2 = scmp.eq.s32.totalorder %s1879_s12, 0 }
  0x1d   : > { %1693 = dma.vmem_to_smem (!%p1969_p11), %s111_s19, 16, %s1881_s27, [#allocation6]  }
  0x1e   : > { %s1989_s28 = scalar_select %p1975_p12, %s1875_s11, %s26_s25  }
  0x1f   : > { %p2692_p1 = scmp.eq.s32.totalorder %s1935_s13, 1  ;;  %p1703_p0 = scmp.lt.s32.totalorder %s1879_s12, 2 }
  0x20   : > { %s121_s30 = sand.u32 1, %s1875_s11   ;;  %p35_p3 = por %p34_p2, %p33_p13 }
  0x21   : > { %p1997_p9 = por %p2692_p1, %p33_p13  ;;  %s1569_s3 = sshll.u32 %s121_s30, 3 }
  0x22   : > { %s1680_s4 = sshll.u32 %s1879_s12, 7  ;;  %s125_s8 = scalar_lea.vmem [#allocation3], %s1569_s3 }
  0x23   : > { %s2693_s29 = scalar_select %p1997_p9, 1, 0 }
  0x24   : > { %s2010_s7 = scalar_lea.hbm %s2677_s0, %s1680_s4  ;;  %s133_s14 = sshll.u32 %s125_s8, 4  ;;  %s2016_s14 = int_to_ptr.vmem [resolvable:$true] %s133_s14 }
  0x25   : > { %p2012_p11 = pnand %p1703_p0, %p35_p3  ;;  %s122_s18 = scalar_lea.sflag [#allocation4], %s121_s30 }
  0x26   : > { %s1779_s19 = scalar_lea.hbm %s2010_s7, 128  ;;  %s1784_s24 = scalar_lea.hbm %s2677_s0, 256 }
  0x27   : > { %p1780_p12 = scmp.ne.s32.totalorder %s2010_s7, %s1779_s19  ;;  %p1781_p13 = pneg %p2012_p11 }
  0x28   : > { %p1785_p10 = scmp.lt.u32.totalorder %s2010_s7, %s2677_s0  ;;  %p1786_p2 = scmp.lt.u32.totalorder %s1784_s24, %s1779_s19 }
  0x29   : > { %p1782_p5 = pnand %p1781_p13, %p1780_p12  ;;  %p1788_p0 = scmp.lt.u32.totalorder %s1779_s19, %s2010_s7 }
  0x2a   : > { %p1787_p1 = por %p1786_p2, %p1785_p10 }
  0x2b   : > { %p1783_p7 = pneg %p1782_p5 }
  0x2c   : > { %p1789_p3 = por %p1788_p0, %p1787_p1 }
  0x2e   : > { %p1790_p6 = pnand %p1789_p3, %p1783_p7 }
  0x30   : > { %1793 = shalt.err (!%p1790_p6)
}
  0x31   : > { %s1794_s27 = scalar_lea.vmem %s2016_s14, 128  ;;  %s1882_s30 = smov [#allocation3]  }
  0x32   : > { %p1795_p12 = scmp.ne.s32.totalorder %s2016_s14, %s1794_s27  ;;  %s1799_s3 = sshll.u32 %s1882_s30, 4  ;;  %s1800_s3 = int_to_ptr.vmem [resolvable:$false] %s1799_s3 }
  0x33   : > { %s1801_s4 = scalar_lea.vmem %s1800_s3, 256  ;;  %p1802_p4 = scmp.lt.s32.totalorder %s2016_s14, %s1800_s3 }
  0x34   : > { %p1797_p5 = pnand %p1795_p12, %p1781_p13  ;;  %p1803_p10 = scmp.lt.s32.totalorder %s1801_s4, %s1794_s27 }
  0x36   : > { %p1798_p9 = pneg %p1797_p5  ;;  %p1804_p2 = por %p1803_p10, %p1802_p4 }
  0x38   : > { %p1805_p1 = pnand %p1804_p2, %p1798_p9 }
  0x3a   : > { %1808 = shalt.err (!%p1805_p1)
}
  0x3b   : > { %1697 = dma.hbm_to_vmem [thread:$0]  (!%p2012_p11), %s2010_s7, 128, %s2016_s14, %s122_s18  }
  0x3c   : > { %142 = sbr.rel (%p1957_p8) target bundleno = 678 (0x2a6), region = 28 }
  0x43   : > { %s2046_s5 = sand.u32 1, %s1871_s10   ;;  %p2695_p4 = scmp.ne.s32.totalorder %s2687_s15, 0 }
  0x44   : > { %s1573_s6 = sshll.u32 %s2046_s5, 3  ;;  %s145_s8 = scalar_lea.sflag [#allocation4], %s2046_s5 }
  0x45   : > { %s2052_s19 = scalar_lea.vmem [#allocation3], %s1573_s6 }
  0x46   : > { %1854 = dma.done.wait (%p2695_p4), %s145_s8, 128  }
  0x47   : > { %1856 = vsyncadd (%p2695_p4), %s145_s8, 4294967168  ;;  %p2696_p6 = scmp.eq.s32.totalorder %s1935_s13, 0 }
  0x49   : > { %1858 = dma.done.wait (%p2696_p6), [#allocation6], 16   ;;  %p2697_p8 = pmov %p2696_p6 }
  0x4b   : > { %1860 = vsyncadd (%p2697_p8), [#allocation6], 4294967280 }
  0x4c   : > { %157 = sfence }
  0x4d   : > { %v180_v0 = vld [vmem:[%s2052_s19] sm:$0xff]  ;;  %vm184_vm0 = vcmask 1043456   ;;  %v1883_v14 = vmov 1966171168   ;;  %v2683_v16 = vlaneseq  ;;  %vm174_vm1 = vcmask 416768   ;;  %s1885_s15 = smov 51  }
  0x4e   : > { %v182_v1 = vcombine.high %v180_v0, %v180_v0  ;;  %v201_v2 = vsel %vm184_vm0, %v180_v0, -inf  ;;  %v185_v3 = vsel %vm184_vm0, %v180_v0, 0.0  ;;  %v221_v15 = vunpack.c.l.s4 %v1883_v14  ;;  %s1598_s20 = sld [smem:[#allocation7 + $0x40]]  ;;  %s1597_s7 = sld [smem:[#allocation7 + $0x39]] }
  0x4f   : > { %v202_v4 = vrot.slane %v201_v2, 4  ;;  %v186_v5 = vrot.slane %v185_v3, 4  ;;  %v1884_v23 = vmov 0.0   ;;  %vm177_vm2 = vcmask 1047960   ;;  %s1612_s14 = sld [smem:[#allocation7 + $0x41]]  ;;  %s1611_s17 = sld [smem:[#allocation7 + $0x3a]] }
  0x50   : > { %v208_v6 = vsel %vm184_vm0, %v182_v1, -inf  ;;  %v192_v7 = vsel %vm184_vm0, %v182_v1, 0.0  ;;  %176 = vst.msk [vmem:[#allocation2 + $0x18] sm:$0xff] %vm174_vm1, %v1884_v23  ;;  %175 = vst.msk [vmem:[#allocation2] sm:$0xff] %vm174_vm1, %v1884_v23  ;;  %v222_v26 = vunpack.c.0.s8 %v221_v15  ;;  %v2066_v27 = vshrl.u32 %v2683_v16, 7  ;;  %s1600_s18 = sld [smem:[#allocation7 + $0x4e]] }
  0x51   : > { %v203_v8 = vmax.f32 %v201_v2, %v202_v4  ;;  %v209_v9 = vrot.slane %v208_v6, 4  ;;  %v187_v10 = vadd.f32 %v186_v5, %v185_v3  ;;  %v193_v11 = vrot.slane %v192_v7, 4  ;;  %179 = vst.msk [vmem:[#allocation2 + $0x28] sm:$0xff] %vm177_vm2, %v1884_v23  ;;  %178 = vst.msk [vmem:[#allocation2 + $0x10] sm:$0xff] %vm177_vm2, %v1884_v23  ;;  %s1599_s22 = sld [smem:[#allocation7 + $0x47]]  ;;  %s1639_s23 = sld [smem:[#allocation7 + $0x3c]] }
  0x52   : > { %v225_v35 = vsub.s32 %v222_v26, %v2066_v27  ;;  %vm240_vm3 = vcmp.ge.s32.totalorder %v2683_v16, 51  ;;  %vm241_vm4 = vcmp.lt.s32.totalorder %v2683_v16, 307  ;;  %s1625_s24 = sld [smem:[#allocation7 + $0x3b]]  ;;  %s1886_s25 = smov 96   ;;  %vm310_vm6 = vcmask 916480  }
  0x53   : > { %v204_v12 = vrot.slane %v203_v8, 2  ;;  %v210_v13 = vmax.f32 %v208_v6, %v209_v9  ;;  %v188_v17 = vrot.slane %v187_v10, 2  ;;  %v194_v18 = vadd.f32 %v193_v11, %v192_v7  ;;  %vm242_vm5 = vmand %vm240_vm3, %vm241_vm4  ;;  %s1887_s26 = smov 112   ;;  %s1626_s27 = sld [smem:[#allocation7 + $0x42]] }
  0x54   : > { %v538_v51 = vstv %s1598_s20  ;;  %v528_v52 = vstv %s1597_s7  ;;  %s1613_s30 = sld [smem:[#allocation7 + $0x48]]  ;;  %s1614_s3 = sld [smem:[#allocation7 + $0x4f]]  ;;  %vm321_vm7 = vcmask 785408   ;;  %vm332_vm8 = vcmask 654336  }
  0x55   : > { %v205_v19 = vmax.f32 %v203_v8, %v204_v12  ;;  %v211_v20 = vrot.slane %v210_v13, 2  ;;  %v189_v21 = vadd.f32 %v188_v17, %v187_v10  ;;  %v195_v22 = vrot.slane %v194_v18, 2  ;;  %s1601_s4 = sld [smem:[#allocation7 + $0x55]]  ;;  %s1888_s8 = smov 64  }
  0x56   : > { %v702_v56 = vstv %s1612_s14  ;;  %v692_v57 = vstv %s1611_s17  ;;  %v558_v60 = vstv %s1600_s18  ;;  %s1653_s20 = sld [smem:[#allocation7 + $0x3d]]  ;;  %s1640_s7 = sld [smem:[#allocation7 + $0x43]]  ;;  %vm343_vm9 = vcmask 523264  }
  0x57   : > { %v206_v24 = vrot.slane %v205_v19, 1  ;;  %v212_v25 = vmax.f32 %v210_v13, %v211_v20  ;;  %v190_v28 = vrot.slane %v189_v21, 1  ;;  %v196_v29 = vadd.f32 %v195_v22, %v194_v18  ;;  %s1602_s14 = sld [smem:[#allocation7 + $0x5c]]  ;;  %s1627_s17 = sld [smem:[#allocation7 + $0x49]] }
  0x58   : > { %v548_v61 = vstv %s1599_s22  ;;  %v1018_v0 = vstv %s1639_s23  ;;  %v856_v1 = vstv %s1625_s24  ;;  %s1641_s18 = sld [smem:[#allocation7 + $0x4a]]  ;;  %s1615_s22 = sld [smem:[#allocation7 + $0x56]]  ;;  %vm354_vm10 = vcmask 392192  }
  0x59   : > { %v207_v30 = vmax.f32 %v205_v19, %v206_v24  ;;  %v213_v31 = vrot.slane %v212_v25, 1  ;;  %v191_v32 = vadd.f32 %v190_v28, %v189_v21  ;;  %v197_v33 = vrot.slane %v196_v29, 1  ;;  %s1890_s23 = smov 48   ;;  %s1667_s24 = sld [smem:[#allocation7 + $0x3e]] }
  0x5a   : > { %v866_v4 = vstv %s1626_s27  ;;  %v712_v5 = vstv %s1613_s30  ;;  %v722_v8 = vstv %s1614_s3  ;;  %s1654_s27 = sld [smem:[#allocation7 + $0x44]]  ;;  %s1616_s30 = sld [smem:[#allocation7 + $0x5d]]  ;;  %vm365_vm11 = vcmask 261120  }
  0x5b   : > { %v214_v34 = vmax.f32 %v212_v25, %v213_v31  ;;  %v198_v36 = vadd.f32 %v197_v33, %v196_v29  ;;  %v215_v37 = vmul.f32 0.25, %v191_v32  ;;  %v568_v9 = vstv %s1601_s4  ;;  %s1628_s3 = sld [smem:[#allocation7 + $0x50]]  ;;  %s1891_s4 = smov 32  }
  0x5c   : > { %v1182_v12 = vstv %s1653_s20  ;;  %v1028_v13 = vstv %s1640_s7  ;;  %s1655_s20 = sld [smem:[#allocation7 + $0x4b]]  ;;  %s1642_s7 = sld [smem:[#allocation7 + $0x51]]  ;;  %vm614_vm12 = vcmask 1039360   ;;  %vm778_vm15 = vcmask 1031168  }
  0x5d   : > { %v247_v38 = vcombine.low %v207_v30, %v214_v34  ;;  %v216_v39 = vmul.f32 0.25, %v198_v36  ;;  %v578_v17 = vstv %s1602_s14  ;;  %v876_v18 = vstv %s1627_s17  ;;  %s1629_s14 = sld [smem:[#allocation7 + $0x57]]  ;;  %s1668_s17 = sld [smem:[#allocation7 + $0x45]] }
  0x5e   : > { %v1038_v21 = vstv %s1641_s18  ;;  %v732_v22 = vstv %s1615_s22  ;;  %s1656_s18 = sld [smem:[#allocation7 + $0x52]]  ;;  %s1643_s22 = sld [smem:[#allocation7 + $0x58]]  ;;  %vm940_vm4 = vcmask 1022976  }
  0x5f   : > { %v254_v40 = vrot.slane %v247_v38, %v225_v35  ;;  %v219_v41 = vcombine.low %v215_v37, %v216_v39  ;;  %v1346_v25 = vstv %s1667_s24  ;;  %s1578_s24 = sld [smem:[#allocation7 + $0x15]]  ;;  %p2708_p11 = scmp.ne.s32.totalorder %s2693_s29, 0 }
  0x60   : > { %v1192_v26 = vstv %s1654_s27  ;;  %v742_v30 = vstv %s1616_s30  ;;  %s1669_s27 = sld [smem:[#allocation7 + $0x4c]]  ;;  %s1580_s30 = sld [smem:[#allocation7 + $0x23]] }
  0x61   : > { %v261_v42 = vrot.slane %v254_v40, %v225_v35  ;;  %v226_v43 = vrot.slane %v219_v41, %v225_v35  ;;  %v886_v31 = vstv %s1628_s3  ;;  %s1576_s3 = sld [smem:[#allocation7 + $0x7]] }
  0x62   : > { %v1202_v34 = vstv %s1655_s20  ;;  %s1591_s20 = sld [smem:[#allocation7 + $0xf]] }
  0x63   : > { %262 = vrot.lane.b32.xlu0 %v261_v42, %s1885_s15  ;;  %v233_v44 = vrot.slane %v226_v43, %v225_v35  ;;  %v1048_v35 = vstv %s1642_s7  ;;  %v896_v38 = vstv %s1629_s14  ;;  %v1356_v39 = vstv %s1668_s17  ;;  %s1577_s7 = sld [smem:[#allocation7 + $0xe]]  ;;  %s1579_s17 = sld [smem:[#allocation7 + $0x1c]] }
  0x64   : > { %v1212_v42 = vstv %s1656_s18  ;;  %v1058_v43 = vstv %s1643_s22  ;;  %s1592_s14 = sld [smem:[#allocation7 + $0x16]]  ;;  %s1618_s18 = sld [smem:[#allocation7 + $0xa]] }
  0x65   : > { %s1590_s22 = sld [smem:[#allocation7 + $0x8]] }
  0x67   : > { %234 = vrot.lane.b32.xlu0 %v233_v44, %s1885_s15  ;;  %s1889_s15 = smov 80  }
  0xd5   : > { %v263_v45 = vpop.permute.xlu0 %262 }
  0xd6   : > { %v264_v46 = vrot.slane %v263_v45, 7 }
  0xd8   : > { %v265_v47 = vsel %vm174_vm1, %v264_v46, %v263_v45  ;;  %v326_v45 = vstv %s1578_s24  ;;  %s1606_s24 = sld [smem:[#allocation7 + $0x17]] }
  0xd9   : > { %268 = vst.msk [vmem:[#allocation2 + $0x18] ss:$8 sm:$0x7] %vm242_vm5, %v265_v47  ;;  %v235_v48 = vpop.permute.xlu0 %234 }
  0xda   : > { %v236_v49 = vrot.slane %v235_v48, 7 }
  0xdc   : > { %v237_v50 = vsel %vm174_vm1, %v236_v49, %v235_v48  ;;  %v1366_v48 = vstv %s1669_s27  ;;  %s1604_s27 = sld [smem:[#allocation7 + $0x9]] }
  0xdd   : > { %243 = vst.msk [vmem:[#allocation2] ss:$8 sm:$0x7] %vm242_vm5, %v237_v50  ;;  %vm1104_vm5 = vcmask 1014784  }
  0xe0   : > { %v2073_v53 = vld [vmem:[#allocation2 + $0x18] ss:$8 sm:$0x7] }
  0xe1   : > { %v539_v54 = vmul.f32 %v538_v51, %v2073_v53  ;;  %v529_v55 = vmul.f32 %v528_v52, %v2073_v53  ;;  %v703_v58 = vmul.f32 %v702_v56, %v2073_v53  ;;  %v693_v59 = vmul.f32 %v692_v57, %v2073_v53 }
  0xe2   : > { %v559_v62 = vmul.f32 %v558_v60, %v2073_v53  ;;  %v549_v63 = vmul.f32 %v548_v61, %v2073_v53  ;;  %v1019_v2 = vmul.f32 %v1018_v0, %v2073_v53  ;;  %v857_v3 = vmul.f32 %v856_v1, %v2073_v53 }
  0xe3   : > { %541 = vrot.lane.b32.xlu0 %v539_v54, %s1886_s25  ;;  %531 = vrot.lane.b32.xlu1 %v529_v55, %s1887_s26  ;;  %v867_v6 = vmul.f32 %v866_v4, %v2073_v53  ;;  %v713_v7 = vmul.f32 %v712_v5, %v2073_v53  ;;  %v723_v10 = vmul.f32 %v722_v8, %v2073_v53  ;;  %v348_v51 = vstv %s1580_s30  ;;  %s1619_s30 = sld [smem:[#allocation7 + $0x11]] }
  0xe4   : > { %v569_v11 = vmul.f32 %v568_v9, %v2073_v53  ;;  %v1183_v14 = vmul.f32 %v1182_v12, %v2073_v53  ;;  %v1029_v15 = vmul.f32 %v1028_v13, %v2073_v53  ;;  %v579_v19 = vmul.f32 %v578_v17, %v2073_v53  ;;  %v2127_v44 = vld [vmem:[#allocation2] ss:$8 sm:$0x7] }
  0xe5   : > { %v877_v20 = vmul.f32 %v876_v18, %v2073_v53  ;;  %v1039_v23 = vmul.f32 %v1038_v21, %v2073_v53  ;;  %v733_v24 = vmul.f32 %v732_v22, %v2073_v53  ;;  %v1347_v28 = vmul.f32 %v1346_v25, %v2073_v53 }
  0xe6   : > { %v1193_v29 = vmul.f32 %v1192_v26, %v2073_v53  ;;  %v743_v32 = vmul.f32 %v742_v30, %v2073_v53  ;;  %v887_v33 = vmul.f32 %v886_v31, %v2073_v53  ;;  %v1203_v36 = vmul.f32 %v1202_v34, %v2073_v53 }
  0xe7   : > { %705 = vrot.lane.b32.xlu0 %v703_v58, %s1886_s25  ;;  %695 = vrot.lane.b32.xlu1 %v693_v59, %s1887_s26  ;;  %v1049_v37 = vmul.f32 %v1048_v35, %v2073_v53  ;;  %v897_v40 = vmul.f32 %v896_v38, %v2073_v53  ;;  %v1357_v41 = vmul.f32 %v1356_v39, %v2073_v53  ;;  %v304_v52 = vstv %s1576_s3  ;;  %s1605_s3 = sld [smem:[#allocation7 + $0x10]] }
  0xe8   : > { %v1213_v46 = vmul.f32 %v1212_v42, %v2073_v53  ;;  %v1059_v47 = vmul.f32 %v1058_v43, %v2073_v53  ;;  %v327_v49 = vmul.f32 %v326_v45, %v2127_v44  ;;  %v1367_v50 = vmul.f32 %v1366_v48, %v2073_v53 }
  0xe9   : > { %v349_v54 = vmul.f32 %v348_v51, %v2127_v44  ;;  %v305_v55 = vmul.f32 %v304_v52, %v2127_v44  ;;  %v474_v56 = vstv %s1591_s20  ;;  %v315_v57 = vstv %s1577_s7  ;;  %s1607_s20 = sld [smem:[#allocation7 + $0x1e]]  ;;  %s1593_s7 = sld [smem:[#allocation7 + $0x1d]] }
  0xea   : > { %v475_v58 = vmul.f32 %v474_v56, %v2127_v44  ;;  %v316_v59 = vmul.f32 %v315_v57, %v2127_v44  ;;  %v484_v60 = vstv %s1592_s14  ;;  %v337_v61 = vstv %s1579_s17  ;;  %s1646_s14 = sld [smem:[#allocation7 + $0xc]]  ;;  %s1632_s17 = sld [smem:[#allocation7 + $0xb]] }
  0xeb   : > { %561 = vrot.lane.b32.xlu0 %v559_v62, %s1888_s8  ;;  %551 = vrot.lane.b32.xlu1 %v549_v63, %s1889_s15  ;;  %v485_v62 = vmul.f32 %v484_v60, %v2127_v44  ;;  %v338_v63 = vmul.f32 %v337_v61, %v2127_v44  ;;  %v792_v0 = vstv %s1618_s18  ;;  %v464_v1 = vstv %s1590_s22  ;;  %s1595_s18 = sld [smem:[#allocation7 + $0x2b]]  ;;  %s1594_s22 = sld [smem:[#allocation7 + $0x24]] }
  0xec   : > { %v648_v4 = vstv %s1606_s24  ;;  %v628_v5 = vstv %s1604_s27  ;;  %v802_v8 = vstv %s1619_s30  ;;  %s1634_s24 = sld [smem:[#allocation7 + $0x19]]  ;;  %s1633_s27 = sld [smem:[#allocation7 + $0x12]] }
  0xed   : > { %v638_v9 = vstv %s1605_s3  ;;  %s1660_s30 = sld [smem:[#allocation7 + $0xd]]  ;;  %s1620_s3 = sld [smem:[#allocation7 + $0x18]] }
  0xef   : > { %1021 = vrot.lane.b32.xlu0 %v1019_v2, %s1887_s26  ;;  %859 = vrot.lane.b32.xlu1 %v857_v3, %s1887_s26  ;;  %v793_v2 = vmul.f32 %v792_v0, %v2127_v44  ;;  %v465_v3 = vmul.f32 %v464_v1, %v2127_v44  ;;  %v658_v12 = vstv %s1607_s20  ;;  %v494_v13 = vstv %s1593_s7  ;;  %s1609_s20 = sld [smem:[#allocation7 + $0x2c]]  ;;  %s1608_s7 = sld [smem:[#allocation7 + $0x25]] }
  0xf0   : > { %v1118_v17 = vstv %s1646_s14  ;;  %v954_v18 = vstv %s1632_s17  ;;  %s1648_s14 = sld [smem:[#allocation7 + $0x1a]]  ;;  %s1647_s17 = sld [smem:[#allocation7 + $0x13]] }
  0xf1   : > { %v514_v21 = vstv %s1595_s18  ;;  %v504_v22 = vstv %s1594_s22  ;;  %s1622_s18 = sld [smem:[#allocation7 + $0x26]]  ;;  %s1621_s22 = sld [smem:[#allocation7 + $0x1f]] }
  0xf2   : > { %v974_v25 = vstv %s1634_s24  ;;  %v964_v26 = vstv %s1633_s27  ;;  %s1636_s24 = sld [smem:[#allocation7 + $0x27]]  ;;  %s1635_s27 = sld [smem:[#allocation7 + $0x20]] }
  0xf3   : > { %869 = vrot.lane.b32.xlu0 %v867_v6, %s1886_s25  ;;  %715 = vrot.lane.b32.xlu1 %v713_v7, %s1889_s15  ;;  %v649_v6 = vmul.f32 %v648_v4, %v2127_v44  ;;  %v629_v7 = vmul.f32 %v628_v5, %v2127_v44  ;;  %v1282_v30 = vstv %s1660_s30  ;;  %v812_v31 = vstv %s1620_s3  ;;  %s1662_s30 = sld [smem:[#allocation7 + $0x1b]]  ;;  %s1661_s3 = sld [smem:[#allocation7 + $0x14]] }
  0xf5   : > { %v678_v34 = vstv %s1609_s20  ;;  %v668_v35 = vstv %s1608_s7  ;;  %s1637_s20 = sld [smem:[#allocation7 + $0x2e]]  ;;  %s1649_s7 = sld [smem:[#allocation7 + $0x21]] }
  0xf6   : > { %v1138_v38 = vstv %s1648_s14  ;;  %v1128_v39 = vstv %s1647_s17  ;;  %s1663_s14 = sld [smem:[#allocation7 + $0x22]]  ;;  %s1623_s17 = sld [smem:[#allocation7 + $0x2d]] }
  0xf7   : > { %725 = vrot.lane.b32.xlu0 %v723_v10, %s1888_s8  ;;  %571 = vrot.lane.b32.xlu1 %v569_v11, %s1890_s23  ;;  %v803_v10 = vmul.f32 %v802_v8, %v2127_v44  ;;  %v639_v11 = vmul.f32 %v638_v9, %v2127_v44  ;;  %v832_v42 = vstv %s1622_s18  ;;  %v822_v43 = vstv %s1621_s22  ;;  %s1664_s18 = sld [smem:[#allocation7 + $0x29]]  ;;  %s1650_s22 = sld [smem:[#allocation7 + $0x28]] }
  0xf8   : > { %v833_v45 = vmul.f32 %v832_v42, %v2127_v44  ;;  %v984_v48 = vstv %s1635_s27  ;;  %s1651_s27 = sld [smem:[#allocation7 + $0x2f]] }
  0xf9   : > { %v985_v52 = vmul.f32 %v984_v48, %v2127_v44 }
  0xfb   : > { %1185 = vrot.lane.b32.xlu0 %v1183_v14, %s1887_s26  ;;  %1031 = vrot.lane.b32.xlu1 %v1029_v15, %s1886_s25  ;;  %v659_v14 = vmul.f32 %v658_v12, %v2127_v44  ;;  %v495_v15 = vmul.f32 %v494_v13, %v2127_v44  ;;  %v1004_v60 = vstv %s1637_s20  ;;  %v1148_v61 = vstv %s1649_s7  ;;  %s1658_s20 = sld [smem:[#allocation7 + $0x60]]  ;;  %s1644_s7 = sld [smem:[#allocation7 + $0x5f]] }
  0xfc   : > { %v1005_v0 = vmul.f32 %v1004_v60, %v2127_v44  ;;  %v1149_v1 = vmul.f32 %v1148_v61, %v2127_v44 }
  0xfd   : > { %v1322_v8 = vstv %s1664_s18  ;;  %v1158_v9 = vstv %s1650_s22  ;;  %s1583_s18 = sld [smem:[#allocation7 + $0x38]]  ;;  %s1671_s22 = sld [smem:[#allocation7 + $0x5a]] }
  0xfe   : > { %v1323_v12 = vmul.f32 %v1322_v8, %v2127_v44  ;;  %v1159_v13 = vmul.f32 %v1158_v9, %v2127_v44 }
  0xff   : > { %581 = vrot.lane.b32.xlu0 %v579_v19, %s1891_s4  ;;  %879 = vrot.lane.b32.xlu1 %v877_v20, %s1889_s15  ;;  %v1119_v19 = vmul.f32 %v1118_v17, %v2127_v44  ;;  %v955_v20 = vmul.f32 %v954_v18, %v2127_v44 }
 0x103   : > { %1041 = vrot.lane.b32.xlu0 %v1039_v23, %s1889_s15  ;;  %735 = vrot.lane.b32.xlu1 %v733_v24, %s1890_s23  ;;  %v515_v23 = vmul.f32 %v514_v21, %v2127_v44  ;;  %v505_v24 = vmul.f32 %v504_v22, %v2127_v44 }
 0x107   : > { %1349 = vrot.lane.b32.xlu0 %v1347_v28, %s1887_s26  ;;  %1195 = vrot.lane.b32.xlu1 %v1193_v29, %s1886_s25  ;;  %v975_v28 = vmul.f32 %v974_v25, %v2127_v44  ;;  %v965_v29 = vmul.f32 %v964_v26, %v2127_v44 }
 0x10b   : > { %745 = vrot.lane.b32.xlu0 %v743_v32, %s1891_s4  ;;  %889 = vrot.lane.b32.xlu1 %v887_v33, %s1888_s8  ;;  %v1283_v32 = vmul.f32 %v1282_v30, %v2127_v44  ;;  %v813_v33 = vmul.f32 %v812_v31, %v2127_v44 }
 0x10f   : > { %1205 = vrot.lane.b32.xlu0 %v1203_v36, %s1889_s15  ;;  %1051 = vrot.lane.b32.xlu1 %v1049_v37, %s1888_s8  ;;  %v679_v36 = vmul.f32 %v678_v34, %v2127_v44  ;;  %v669_v37 = vmul.f32 %v668_v35, %v2127_v44 }
 0x113   : > { %899 = vrot.lane.b32.xlu0 %v897_v40, %s1890_s23  ;;  %1359 = vrot.lane.b32.xlu1 %v1357_v41, %s1886_s25  ;;  %v1139_v40 = vmul.f32 %v1138_v38, %v2127_v44  ;;  %v1129_v41 = vmul.f32 %v1128_v39, %v2127_v44 }
 0x117   : > { %1215 = vrot.lane.b32.xlu0 %v1213_v46, %s1888_s8  ;;  %1061 = vrot.lane.b32.xlu1 %v1059_v47, %s1890_s23  ;;  %v823_v46 = vmul.f32 %v822_v43, %v2127_v44  ;;  %v994_v47 = vstv %s1636_s24  ;;  %s1630_s24 = sld [smem:[#allocation7 + $0x5e]] }
 0x118   : > { %v995_v51 = vmul.f32 %v994_v47, %v2127_v44 }
 0x11b   : > { %1369 = vrot.lane.b32.xlu1 %v1367_v50, %s1889_s15  ;;  %329 = vrot.lane.b32.xlu0 %v327_v49, %s1889_s15 }
 0x11f   : > { %351 = vrot.lane.b32.xlu0 %v349_v54, %s1890_s23  ;;  %307 = vrot.lane.b32.xlu1 %v305_v55, %s1887_s26  ;;  %v1302_v54 = vstv %s1662_s30  ;;  %v1292_v55 = vstv %s1661_s3  ;;  %s1657_s30 = sld [smem:[#allocation7 + $0x59]]  ;;  %s1665_s3 = sld [smem:[#allocation7 + $0x30]] }
 0x123   : > { %477 = vrot.lane.b32.xlu0 %v475_v58, %s1886_s25  ;;  %318 = vrot.lane.b32.xlu1 %v316_v59, %s1886_s25  ;;  %v1303_v58 = vmul.f32 %v1302_v54, %v2127_v44  ;;  %v1293_v59 = vmul.f32 %v1292_v55, %v2127_v44 }
 0x125   : > { %v1222_v21 = vstv %s1657_s30  ;;  %v1332_v22 = vstv %s1665_s3  ;;  %s1587_s30 = sld [smem:[#allocation7 + $0x54]]  ;;  %s1584_s3 = sld [smem:[#allocation7 + $0x3f]] }
 0x126   : > { %v1223_v25 = vmul.f32 %v1222_v21, %v2073_v53  ;;  %v1333_v26 = vmul.f32 %v1332_v22, %v2127_v44  ;;  %v298_v22 = vld [vmem:[#allocation2] ss:$8 sm:$0x3] }
 0x127   : > { %487 = vrot.lane.b32.xlu0 %v485_v62, %s1889_s15  ;;  %340 = vrot.lane.b32.xlu1 %v338_v63, %s1888_s8 }
 0x12b   : > { %795 = vrot.lane.b32.xlu0 %v793_v2, %s1887_s26  ;;  %467 = vrot.lane.b32.xlu1 %v465_v3, %s1887_s26  ;;  %v1312_v2 = vstv %s1663_s14  ;;  %v842_v3 = vstv %s1623_s17  ;;  %s1672_s14 = sld [smem:[#allocation7 + $0x61]]  ;;  %s1670_s17 = sld [smem:[#allocation7 + $0x53]] }
 0x12f   : > { %651 = vrot.lane.b32.xlu0 %v649_v6, %s1889_s15  ;;  %631 = vrot.lane.b32.xlu1 %v629_v7, %s1887_s26  ;;  %v1313_v6 = vmul.f32 %v1312_v2, %v2127_v44  ;;  %v843_v7 = vmul.f32 %v842_v3, %v2127_v44 }
 0x131   : > { %v1396_v34 = vstv %s1672_s14  ;;  %v1376_v35 = vstv %s1670_s17  ;;  %s2331_s14 = sld [smem:[#allocation7 + $0x34]]  ;;  %s2334_s17 = sld [smem:[#allocation7 + $0x3]] }
 0x132   : > { %v1397_v38 = vmul.f32 %v1396_v34, %v2073_v53  ;;  %v1377_v39 = vmul.f32 %v1376_v35, %v2073_v53 }
 0x133   : > { %805 = vrot.lane.b32.xlu0 %v803_v10, %s1886_s25  ;;  %641 = vrot.lane.b32.xlu1 %v639_v11, %s1886_s25 }
 0x137   : > { %661 = vrot.lane.b32.xlu0 %v659_v14, %s1888_s8  ;;  %497 = vrot.lane.b32.xlu1 %v495_v15, %s1888_s8  ;;  %v906_v14 = vstv %s1630_s24  ;;  %v1168_v15 = vstv %s1651_s27  ;;  %s1585_s24 = sld [smem:[#allocation7 + $0x46]]  ;;  %s1581_s27 = sld [smem:[#allocation7 + $0x2a]] }
 0x13b   : > { %1121 = vrot.lane.b32.xlu0 %v1119_v19, %s1887_s26  ;;  %957 = vrot.lane.b32.xlu1 %v955_v20, %s1887_s26  ;;  %v907_v19 = vmul.f32 %v906_v14, %v2073_v53  ;;  %v1169_v20 = vmul.f32 %v1168_v15, %v2127_v44 }
 0x13d   : > { %v397_v47 = vstv %s1585_s24  ;;  %v359_v48 = vstv %s1581_s27  ;;  %s2341_s24 = sld [smem:[#allocation7 + $0x4]]  ;;  %s2344_s27 = sld [smem:[#allocation7 + $0x6]] }
 0x13e   : > { %v398_v54 = vmul.f32 %v397_v47, %v2073_v53  ;;  %v360_v55 = vmul.f32 %v359_v48, %v2127_v44 }
 0x13f   : > { %517 = vrot.lane.b32.xlu0 %v515_v23, %s1891_s4  ;;  %507 = vrot.lane.b32.xlu1 %v505_v24, %s1890_s23 }
 0x143   : > { %977 = vrot.lane.b32.xlu0 %v975_v28, %s1889_s15  ;;  %967 = vrot.lane.b32.xlu1 %v965_v29, %s1886_s25  ;;  %v1232_v28 = vstv %s1658_s20  ;;  %v1068_v29 = vstv %s1644_s7  ;;  %s1586_s20 = sld [smem:[#allocation7 + $0x4d]]  ;;  %s1588_s7 = sld [smem:[#allocation7 + $0x5b]] }
 0x147   : > { %1285 = vrot.lane.b32.xlu0 %v1283_v32, %s1887_s26  ;;  %815 = vrot.lane.b32.xlu1 %v813_v33, %s1889_s15  ;;  %v1233_v32 = vmul.f32 %v1232_v28, %v2073_v53  ;;  %v1069_v33 = vmul.f32 %v1068_v29, %v2073_v53 }
 0x149   : > { %v407_v2 = vstv %s1586_s20  ;;  %v427_v8 = vstv %s1588_s7  ;;  %s1893_s20 = smov 126   ;;  %s2581_s7 = sld [smem:[#allocation7 + $0x31]] }
 0x14b   : > { %681 = vrot.lane.b32.xlu0 %v679_v36, %s1891_s4  ;;  %671 = vrot.lane.b32.xlu1 %v669_v37, %s1890_s23 }
 0x14f   : > { %1141 = vrot.lane.b32.xlu0 %v1139_v40, %s1889_s15  ;;  %1131 = vrot.lane.b32.xlu1 %v1129_v41, %s1886_s25  ;;  %v377_v40 = vstv %s1583_s18  ;;  %v1386_v41 = vstv %s1671_s22  ;;  %s2337_s18 = sld [smem:[#allocation7 + $0x36]]  ;;  %s2339_s22 = sld [smem:[#allocation7 + $0x5]] }
 0x153   : > { %835 = vrot.lane.b32.xlu0 %v833_v45, %s1890_s23  ;;  %825 = vrot.lane.b32.xlu1 %v823_v46, %s1888_s8  ;;  %v378_v45 = vmul.f32 %v377_v40, %v2073_v53  ;;  %v1387_v46 = vmul.f32 %v1386_v41, %v2073_v53 }
 0x155   : > { %v2193_v49 = vpop.permute.xlu0 %541  ;;  %v2195_v50 = vpop.permute.xlu1 %531 }
 0x157   : > { %997 = vrot.lane.b32.xlu0 %v995_v51, %s1890_s23  ;;  %987 = vrot.lane.b32.xlu1 %v985_v52, %s1888_s8 }
 0x159   : > { %v2201_v56 = vpop.permute.xlu0 %705  ;;  %v2203_v57 = vpop.permute.xlu1 %695 }
 0x15b   : > { %1305 = vrot.lane.b32.xlu0 %v1303_v58, %s1889_s15  ;;  %1295 = vrot.lane.b32.xlu1 %v1293_v59, %s1886_s25  ;;  %v417_v58 = vstv %s1587_s30  ;;  %v387_v59 = vstv %s1584_s3  ;;  %s2347_s30 = sld [smem:[#allocation7 + $0x37]]  ;;  %s1892_s3 = smov 127  }
 0x15d   : > { %v2209_v62 = vpop.permute.xlu0 %561  ;;  %v2211_v63 = vpop.permute.xlu1 %551 }
 0x15f   : > { %1007 = vrot.lane.b32.xlu0 %v1005_v0, %s1891_s4  ;;  %1151 = vrot.lane.b32.xlu1 %v1149_v1, %s1888_s8  ;;  %v418_v0 = vmul.f32 %v417_v58, %v2073_v53  ;;  %v388_v1 = vmul.f32 %v387_v59, %v2073_v53 }
 0x161   : > { %v2217_v4 = vpop.permute.xlu0 %1021  ;;  %v2219_v5 = vpop.permute.xlu1 %859 }
 0x163   : > { %1315 = vrot.lane.b32.xlu0 %v1313_v6, %s1888_s8  ;;  %845 = vrot.lane.b32.xlu1 %v843_v7, %s1891_s4  ;;  %v408_v7 = vmul.f32 %v407_v2, %v2073_v53 }
 0x165   : > { %v2225_v10 = vpop.permute.xlu0 %869  ;;  %v2227_v11 = vpop.permute.xlu1 %715 }
 0x167   : > { %1325 = vrot.lane.b32.xlu0 %v1323_v12, %s1890_s23  ;;  %1161 = vrot.lane.b32.xlu1 %v1159_v13, %s1890_s23  ;;  %v428_v13 = vmul.f32 %v427_v8, %v2073_v53 }
 0x169   : > { %v2233_v17 = vpop.permute.xlu0 %725  ;;  %v2235_v18 = vpop.permute.xlu1 %571 }
 0x16b   : > { %909 = vrot.lane.b32.xlu0 %v907_v19, %s1891_s4  ;;  %1171 = vrot.lane.b32.xlu1 %v1169_v20, %s1891_s4 }
 0x16d   : > { %v2241_v23 = vpop.permute.xlu0 %1185  ;;  %v2243_v24 = vpop.permute.xlu1 %1031 }
 0x16f   : > { %1225 = vrot.lane.b32.xlu0 %v1223_v25, %s1890_s23  ;;  %1335 = vrot.lane.b32.xlu1 %v1333_v26, %s1891_s4 }
 0x171   : > { %v2249_v30 = vpop.permute.xlu0 %581  ;;  %v2251_v31 = vpop.permute.xlu1 %879 }
 0x173   : > { %1235 = vrot.lane.b32.xlu0 %v1233_v32, %s1891_s4  ;;  %1071 = vrot.lane.b32.xlu1 %v1069_v33, %s1891_s4 }
 0x175   : > { %v2257_v36 = vpop.permute.xlu0 %1041  ;;  %v2259_v37 = vpop.permute.xlu1 %735 }
 0x177   : > { %1399 = vrot.lane.b32.xlu0 %v1397_v38, %s1891_s4  ;;  %1379 = vrot.lane.b32.xlu1 %v1377_v39, %s1888_s8 }
 0x179   : > { %v2265_v42 = vpop.permute.xlu0 %1349  ;;  %v2267_v43 = vpop.permute.xlu1 %1195 }
 0x17b   : > { %380 = vrot.lane.b32.xlu0 %v378_v45, %s1887_s26  ;;  %1389 = vrot.lane.b32.xlu1 %v1387_v46, %s1890_s23  ;;  %s297_s26 = sld [smem:[#allocation7]] }
 0x17d   : > { %v2273_v51 = vpop.permute.xlu0 %745  ;;  %v2275_v52 = vpop.permute.xlu1 %889 }
 0x17f   : > { %400 = vrot.lane.b32.xlu0 %v398_v54, %s1889_s15  ;;  %362 = vrot.lane.b32.xlu1 %v360_v55, %s1891_s4  ;;  %s2321_s15 = sld [smem:[#allocation7 + $0x32]] }
 0x181   : > { %v2281_v60 = vpop.permute.xlu0 %1205  ;;  %v2283_v61 = vpop.permute.xlu1 %1051  ;;  %v299_v21 = vstv %s297_s26  ;;  %s1894_s26 = smov 125  }
 0x182   : > { %v300_v28 = vmul.f32 %v299_v21, %v298_v22 }
 0x183   : > { %420 = vrot.lane.b32.xlu0 %v418_v0, %s1890_s23  ;;  %390 = vrot.lane.b32.xlu1 %v388_v1, %s1886_s25  ;;  %s1589_s25 = sld [smem:[#allocation7 + $0x1]]  ;;  %s2327_s23 = sld [smem:[#allocation7 + $0x33]] }
 0x185   : > { %v2289_v3 = vpop.permute.xlu0 %899  ;;  %v2291_v6 = vpop.permute.xlu1 %1359 }
 0x186   : > { %2698 = vst [vmem:[#allocation12_spill] sm:$0xff] %v2291_v6  ;;  %v563_v6 = vrot.slane %v2209_v62, 1 }
 0x187   : > { %410 = vrot.lane.b32.xlu1 %v408_v7, %s1888_s8  ;;  %s1603_s8 = sld [smem:[#allocation7 + $0x2]] }
 0x189   : > { %v2295_v9 = vpop.permute.xlu0 %1215  ;;  %v2297_v12 = vpop.permute.xlu1 %1061 }
 0x18a   : > { %2699 = vst [vmem:[#allocation13_spill] sm:$0xff] %v2295_v9 }
 0x18b   : > { %430 = vrot.lane.b32.xlu1 %v428_v13, %s1891_s4  ;;  %v460_v13 = vstv %s1589_s25  ;;  %s2329_s4 = sld [smem:[#allocation7 + $0x35]]  ;;  %s1895_s25 = smov 124  }
 0x18c   : > { %v461_v22 = vmul.f32 %v460_v13, %v2127_v44 }
 0x18d   : > { %v2301_v14 = vpop.permute.xlu1 %1369  ;;  %v330_v15 = vpop.permute.xlu0 %329 }
 0x18e   : > { %2700 = vst [vmem:[#allocation14_spill] sm:$0xff] %v2301_v14  ;;  %v331_v33 = vrot.slane %v330_v15, 1 }
 0x190   : > { %v333_v45 = vsel %vm332_vm8, %v330_v15, %v331_v33 }
 0x191   : > { %v352_v19 = vpop.permute.xlu0 %351  ;;  %v308_v20 = vpop.permute.xlu1 %307 }
 0x192   : > { %v309_v25 = vrot.slane %v308_v20, 1  ;;  %v353_v46 = vrot.slane %v352_v19, 1 }
 0x194   : > { %v311_v26 = vsel %vm310_vm6, %v308_v20, %v309_v25  ;;  %v355_v0 = vsel %vm354_vm10, %v352_v19, %v353_v46 }
 0x195   : > { %v478_v29 = vpop.permute.xlu0 %477  ;;  %v319_v32 = vpop.permute.xlu1 %318  ;;  %v313_v35 = vadd.f32 %v311_v26, %v300_v28 }
 0x196   : > { %v320_v34 = vrot.slane %v319_v32, 1  ;;  %v479_v25 = vrot.slane %v478_v29, 1 }
 0x198   : > { %v322_v38 = vsel %vm321_vm7, %v319_v32, %v320_v34  ;;  %v480_v32 = vsel %vm321_vm7, %v478_v29, %v479_v25  ;;  %v624_v29 = vstv %s1603_s8  ;;  %v524_v25 = vstv %s2321_s15  ;;  %s1896_s8 = smov 123   ;;  %s1897_s15 = smov 122  }
 0x199   : > { %v324_v39 = vadd.f32 %v322_v38, %v313_v35  ;;  %v488_v40 = vpop.permute.xlu0 %487  ;;  %v341_v41 = vpop.permute.xlu1 %340 }
 0x19a   : > { %v342_v47 = vrot.slane %v341_v41, 1  ;;  %v489_v33 = vrot.slane %v488_v40, 1 }
 0x19b   : > { %v335_v48 = vadd.f32 %v333_v45, %v324_v39 }
 0x19c   : > { %v344_v54 = vsel %vm343_vm9, %v341_v41, %v342_v47  ;;  %v490_v45 = vsel %vm332_vm8, %v488_v40, %v489_v33 }
 0x19d   : > { %v346_v55 = vadd.f32 %v344_v54, %v335_v48  ;;  %v2307_v58 = vpop.permute.xlu0 %795  ;;  %v468_v59 = vpop.permute.xlu1 %467 }
 0x19e   : > { %v469_v8 = vrot.slane %v468_v59, 1 }
 0x19f   : > { %v2310_v1 = vadd.f32 %v355_v0, %v346_v55 }
 0x1a0   : > { %v470_v21 = vsel %vm310_vm6, %v468_v59, %v469_v8  ;;  %v625_v8 = vmul.f32 %v624_v29, %v2127_v44 }
 0x1a1   : > { %2701 = vst [vmem:[#allocation15_spill] sm:$0xff] %v2310_v1  ;;  %v2312_v2 = vpop.permute.xlu0 %651  ;;  %v632_v7 = vpop.permute.xlu1 %631  ;;  %v472_v26 = vadd.f32 %v470_v21, %v461_v22  ;;  %v2350_v21 = vsub.s32 0, %v2066_v27 }
 0x1a2   : > { %v633_v41 = vrot.slane %v632_v7, 1 }
 0x1a3   : > { %v482_v35 = vadd.f32 %v480_v32, %v472_v26 }
 0x1a4   : > { %v634_v59 = vsel %vm310_vm6, %v632_v7, %v633_v41  ;;  %v2356_v7 = vsub.s32 1, %v2066_v27 }
 0x1a5   : > { %v2314_v15 = vpop.permute.xlu0 %805  ;;  %v642_v20 = vpop.permute.xlu1 %641  ;;  %v492_v48 = vadd.f32 %v490_v45, %v482_v35  ;;  %v653_v35 = vrot.slane %v2312_v2, 1  ;;  %v688_v45 = vstv %s2327_s23  ;;  %s1681_s23 = sshll.u32 %s1935_s13, 7  ;;  %s1898_s13 = smov [#allocation8]  }
 0x1a6   : > { %v643_v46 = vrot.slane %v642_v20, 1 }
 0x1a8   : > { %v644_v22 = vsel %vm321_vm7, %v642_v20, %v643_v46  ;;  %v533_v20 = vrot.slane %v2195_v50, 1  ;;  %v525_v46 = vmul.f32 %v524_v25, %v2073_v53  ;;  %v553_v25 = vrot.slane %v2211_v63, 1 }
 0x1a9   : > { %v2318_v28 = vpop.permute.xlu0 %661  ;;  %v498_v19 = vpop.permute.xlu1 %497 }
 0x1aa   : > { %v499_v34 = vrot.slane %v498_v19, 1 }
 0x1ac   : > { %v500_v47 = vsel %vm343_vm9, %v498_v19, %v499_v34  ;;  %v636_v19 = vadd.f32 %v634_v59, %v625_v8  ;;  %v788_v59 = vstv %s2334_s17  ;;  %v852_v8 = vstv %s2331_s14 }
 0x1ad   : > { %v2323_v38 = vpop.permute.xlu0 %1121  ;;  %v2325_v39 = vpop.permute.xlu1 %957  ;;  %v502_v13 = vadd.f32 %v500_v47, %v492_v48  ;;  %v1014_v48 = vstv %s2329_s4  ;;  %s173_s4 = scalar_lea.vmem [#allocation8], %s1573_s6  ;;  %s1813_s6 = sshll.u32 %s1898_s13, 4  ;;  %s1814_s6 = int_to_ptr.vmem [resolvable:$false] %s1813_s6 }
 0x1ae   : > { %v646_v29 = vadd.f32 %v644_v22, %v636_v19  ;;  %v534_v22 = vsel %vm310_vm6, %v2195_v50, %v533_v20  ;;  %v654_v19 = vsel %vm332_vm8, %v2312_v2, %v653_v35  ;;  %s1483_s14 = sshll.u32 %s173_s4, 4  ;;  %s2635_s14 = int_to_ptr.vmem [resolvable:$true] %s1483_s14 }
 0x1af   : > { %p1816_p0 = scmp.lt.s32.totalorder %s2635_s14, %s1814_s6 }
 0x1b0   : > { %v656_v14 = vadd.f32 %v654_v19, %v646_v29 }
 0x1b1   : > { %v518_v54 = vpop.permute.xlu0 %517  ;;  %v508_v55 = vpop.permute.xlu1 %507 }
 0x1b2   : > { %v519_v0 = vrot.slane %v518_v54, 1  ;;  %v509_v40 = vrot.slane %v508_v55, 1 }
 0x1b4   : > { %v510_v26 = vsel %vm354_vm10, %v508_v55, %v509_v40  ;;  %v520_v41 = vsel %vm365_vm11, %v518_v54, %v519_v0  ;;  %v543_v55 = vrot.slane %v2193_v49, 1  ;;  %v663_v40 = vrot.slane %v2318_v28, 1 }
 0x1b5   : > { %v512_v32 = vadd.f32 %v510_v26, %v502_v13  ;;  %v2358_v33 = vpop.permute.xlu0 %977  ;;  %v2360_v34 = vpop.permute.xlu1 %967  ;;  %v1114_v13 = vstv %s2339_s22  ;;  %v950_v26 = vstv %s2341_s24  ;;  %v1178_v0 = vstv %s2337_s18  ;;  %s2633_s22 = scalar_lea.hbm %s2679_s2, %s1681_s23  ;;  %s1469_s24 = scalar_lea.sflag [#allocation5], %s2046_s5 }
 0x1b6   : > { %v664_v50 = vsel %vm343_vm9, %v2318_v28, %v663_v40  ;;  %v2395_v20 = vmul.f32 %v1114_v13, %v2127_v44  ;;  %v951_v2 = vmul.f32 %v950_v26, %v2127_v44  ;;  %v959_v26 = vrot.slane %v2325_v39, 1 }
 0x1b7   : > { %v522_v47 = vadd.f32 %v520_v41, %v512_v32  ;;  %v1278_v32 = vstv %s2344_s27  ;;  %v2386_v41 = vmul.f32 %v788_v59, %v2127_v44  ;;  %v666_v40 = vadd.f32 %v664_v50, %v656_v14  ;;  %s1809_s27 = scalar_lea.vmem %s2635_s14, 128 }
 0x1b8   : > { %v2399_v59 = vmul.f32 %v1278_v32, %v2127_v44  ;;  %v564_v44 = vsel %vm343_vm9, %v2209_v62, %v563_v6  ;;  %v697_v14 = vrot.slane %v2203_v57, 1  ;;  %v969_v6 = vrot.slane %v2360_v34, 1  ;;  %p1810_p9 = scmp.ne.s32.totalorder %s2635_s14, %s1809_s27 }
 0x1b9   : > { %v526_v16 = vadd.f32 %v525_v46, %v522_v47  ;;  %v2374_v1 = vpop.permute.xlu0 %1285  ;;  %v2376_v54 = vpop.permute.xlu1 %815  ;;  %v544_v47 = vsel %vm321_vm7, %v2193_v49, %v543_v55  ;;  %v554_v49 = vsel %vm332_vm8, %v2211_v63, %v553_v25  ;;  %v573_v55 = vrot.slane %v2235_v18, 1 }
 0x1ba   : > { %v2406_v46 = vmul.f32 %v1014_v48, %v2073_v53  ;;  %v707_v25 = vrot.slane %v2201_v56, 1  ;;  %p1811_p13 = pnand %p1810_p9, %p2708_p11 }
 0x1bb   : > { %v536_v9 = vadd.f32 %v534_v22, %v526_v16  ;;  %v689_v16 = vmul.f32 %v688_v45, %v2073_v53  ;;  %v583_v45 = vrot.slane %v2249_v30, 1  ;;  %v574_v62 = vsel %vm354_vm10, %v2235_v18, %v573_v55 }
 0x1bc   : > { %v708_v55 = vsel %vm321_vm7, %v2201_v56, %v707_v25  ;;  %p1812_p7 = pneg %p1811_p13 }
 0x1bd   : > { %v546_v35 = vadd.f32 %v544_v47, %v536_v9  ;;  %v682_v29 = vpop.permute.xlu0 %681  ;;  %v672_v22 = vpop.permute.xlu1 %671  ;;  %v2409_v9 = vmul.f32 %v852_v8, %v2073_v53  ;;  %v1023_v8 = vrot.slane %v2217_v4, 1  ;;  %v584_v18 = vsel %vm365_vm11, %v2249_v30, %v583_v45 }
 0x1be   : > { %v683_v19 = vrot.slane %v682_v29, 1  ;;  %v673_v28 = vrot.slane %v672_v22, 1  ;;  %v797_v30 = vrot.slane %v2307_v58, 1 }
 0x1bf   : > { %v556_v13 = vadd.f32 %v554_v49, %v546_v35  ;;  %v2428_v49 = vsub.s32 2, %v2066_v27  ;;  %v727_v27 = vrot.slane %v2233_v17, 1 }
 0x1c0   : > { %v674_v63 = vsel %vm354_vm10, %v672_v22, %v673_v28  ;;  %v684_v50 = vsel %vm365_vm11, %v682_v29, %v683_v19  ;;  %v2430_v28 = vld [vmem:[#allocation2 + $0x18] ss:$8 sm:$0x7]  ;;  %v960_v29 = vsel %vm310_vm6, %v2325_v39, %v959_v26  ;;  %v970_v39 = vsel %vm321_vm7, %v2360_v34, %v969_v6 }
 0x1c1   : > { %v676_v32 = vadd.f32 %v674_v63, %v666_v40  ;;  %v2418_v47 = vpop.permute.xlu0 %1141  ;;  %v2420_v48 = vpop.permute.xlu1 %1131  ;;  %v566_v53 = vadd.f32 %v564_v44, %v556_v13  ;;  %v2433_v40 = vmul.f32 %v2430_v28, %v1178_v0  ;;  %v861_v13 = vrot.slane %v2219_v5, 1 }
 0x1c2   : > { %v717_v44 = vrot.slane %v2227_v11, 1  ;;  %v962_v56 = vadd.f32 %v960_v29, %v951_v2  ;;  %v728_v34 = vsel %vm343_vm9, %v2233_v17, %v727_v27 }
 0x1c3   : > { %v686_v35 = vadd.f32 %v684_v50, %v676_v32  ;;  %v576_v22 = vadd.f32 %v574_v62, %v566_v53  ;;  %v698_v53 = vsel %vm310_vm6, %v2203_v57, %v697_v14  ;;  %v2450_v62 = vsel %vm310_vm6, %v2217_v4, %v1023_v8 }
 0x1c4   : > { %v2459_v25 = vsel %vm310_vm6, %v2219_v5, %v861_v13  ;;  %v718_v57 = vsel %vm332_vm8, %v2227_v11, %v717_v44  ;;  %v807_v4 = vrot.slane %v2314_v15, 1  ;;  %v979_v14 = vrot.slane %v2358_v33, 1 }
 0x1c5   : > { %v690_v19 = vadd.f32 %v689_v16, %v686_v35  ;;  %v2444_v63 = vpop.permute.xlu0 %835  ;;  %v826_v0 = vpop.permute.xlu1 %825  ;;  %v586_v32 = vadd.f32 %v584_v18, %v576_v22  ;;  %v871_v8 = vrot.slane %v2225_v10, 1  ;;  %v972_v2 = vadd.f32 %v970_v39, %v962_v56 }
 0x1c6   : > { %v737_v35 = vrot.slane %v2259_v37, 1  ;;  %v798_v11 = vsel %vm310_vm6, %v2307_v58, %v797_v30  ;;  %v817_v22 = vrot.slane %v2376_v54, 1  ;;  %v1033_v44 = vrot.slane %v2243_v24, 1 }
 0x1c7   : > { %v700_v45 = vadd.f32 %v698_v53, %v690_v19  ;;  %v603_v16 = vrot.slane %v586_v32, %v2356_v7  ;;  %v599_v26 = vrot.slane %v586_v32, %v2350_v21  ;;  %v747_v18 = vrot.slane %v2273_v51, 1 }
 0x1c8   : > { %v607_v29 = vrot.slane %v586_v32, %v2428_v49  ;;  %v980_v27 = vsel %vm332_vm8, %v2358_v33, %v979_v14  ;;  %v827_v19 = vrot.slane %v826_v0, 1  ;;  %v800_v58 = vadd.f32 %v798_v11, %v2386_v41 }
 0x1c9   : > { %v710_v6 = vadd.f32 %v708_v55, %v700_v45  ;;  %v998_v50 = vpop.permute.xlu0 %997  ;;  %610 = vrot.lane.b32.xlu1 %v603_v16, %s1892_s3  ;;  %608 = vrot.lane.b32.xlu0 %v599_v26, %s1892_s3  ;;  %v988_v5 = vpop.permute.xlu1 %987  ;;  %v808_v55 = vsel %vm321_vm7, %v2314_v15, %v807_v4  ;;  %v1123_v30 = vrot.slane %v2323_v38, 1  ;;  %v982_v39 = vadd.f32 %v980_v27, %v972_v2 }
 0x1ca   : > { %v989_v13 = vrot.slane %v988_v5, 1  ;;  %v2486_v32 = vsel %vm321_vm7, %v2225_v10, %v871_v8  ;;  %v738_v15 = vsel %vm354_vm10, %v2259_v37, %v737_v35  ;;  %v818_v33 = vsel %vm332_vm8, %v2376_v54, %v817_v22 }
 0x1cb   : > { %v720_v17 = vadd.f32 %v718_v57, %v710_v6  ;;  %v999_v26 = vrot.slane %v998_v50, 1  ;;  %v1187_v41 = vrot.slane %v2241_v23, 1  ;;  %v810_v57 = vadd.f32 %v808_v55, %v800_v58 }
 0x1cc   : > { %v990_v53 = vsel %vm343_vm9, %v988_v5, %v989_v13  ;;  %v1034_v2 = vsel %vm321_vm7, %v2243_v24, %v1033_v44  ;;  %v1133_v10 = vrot.slane %v2420_v48, 1  ;;  %v828_v8 = vsel %vm343_vm9, %v826_v0, %v827_v19 }
 0x1cd   : > { %v2482_v56 = vpop.permute.xlu0 %1305  ;;  %612 = vrot.lane.b32.xlu0 %v607_v29, %s1892_s3  ;;  %v1296_v45 = vpop.permute.xlu1 %1295  ;;  %v730_v16 = vadd.f32 %v728_v34, %v720_v17  ;;  %v992_v4 = vadd.f32 %v990_v53, %v982_v39  ;;  %v748_v34 = vsel %vm365_vm11, %v2273_v51, %v747_v18  ;;  %v881_v37 = vrot.slane %v2251_v31, 1 }
 0x1ce   : > { %v1124_v54 = vsel %vm310_vm6, %v2323_v38, %v1123_v30  ;;  %v820_v6 = vadd.f32 %v818_v33, %v810_v57  ;;  %v1287_v22 = vrot.slane %v2374_v1, 1  ;;  %v837_v24 = vrot.slane %v2444_v63, 1 }
 0x1cf   : > { %v740_v14 = vadd.f32 %v738_v15, %v730_v16  ;;  %v1000_v13 = vsel %vm354_vm10, %v998_v50, %v999_v26  ;;  %v1043_v29 = vrot.slane %v2257_v36, 1  ;;  %v1134_v38 = vsel %vm321_vm7, %v2420_v48, %v1133_v10 }
 0x1d0   : > { %v830_v44 = vadd.f32 %v828_v8, %v820_v6  ;;  %v1002_v18 = vadd.f32 %v1000_v13, %v992_v4  ;;  %v1297_v55 = vrot.slane %v1296_v45, 1  ;;  %v882_v19 = vsel %vm332_vm8, %v2251_v31, %v881_v37 }
 0x1d1   : > { %v1008_v5 = vpop.permute.xlu0 %1007  ;;  %v1152_v35 = vpop.permute.xlu1 %1151  ;;  %v750_v11 = vadd.f32 %v748_v34, %v740_v14  ;;  %v1126_v50 = vadd.f32 %v1124_v54, %v2395_v20  ;;  %v1143_v53 = vrot.slane %v2418_v47, 1  ;;  %v1288_v16 = vsel %vm310_vm6, %v2374_v1, %v1287_v22 }
 0x1d2   : > { %v1009_v51 = vrot.slane %v1008_v5, 1  ;;  %v838_v48 = vsel %vm354_vm10, %v2444_v63, %v837_v24  ;;  %v1153_v15 = vrot.slane %v1152_v35, 1  ;;  %v1044_v4 = vsel %vm332_vm8, %v2257_v36, %v1043_v29 }
 0x1d3   : > { %v767_v0 = vrot.slane %v750_v11, %v2356_v7  ;;  %v763_v17 = vrot.slane %v750_v11, %v2350_v21  ;;  %v1136_v26 = vadd.f32 %v1134_v38, %v1126_v50  ;;  %v840_v20 = vadd.f32 %v838_v48, %v830_v44 }
 0x1d4   : > { %v1010_v27 = vsel %vm365_vm11, %v1008_v5, %v1009_v51  ;;  %v771_v57 = vrot.slane %v750_v11, %v2428_v49  ;;  %v1053_v14 = vrot.slane %v2283_v61, 1  ;;  %v1298_v34 = vsel %vm321_vm7, %v1296_v45, %v1297_v55 }
 0x1d5   : > { %v1012_v58 = vadd.f32 %v1010_v27, %v1002_v18  ;;  %v1316_v30 = vpop.permute.xlu0 %1315  ;;  %774 = vrot.lane.b32.xlu0 %v767_v0, %s1893_s20  ;;  %772 = vrot.lane.b32.xlu1 %v763_v17, %s1893_s20  ;;  %v846_v39 = vpop.permute.xlu1 %845  ;;  %v1290_v10 = vadd.f32 %v1288_v16, %v2399_v59  ;;  %v1144_v63 = vsel %vm332_vm8, %v2418_v47, %v1143_v53  ;;  %v1307_v6 = vrot.slane %v2482_v56, 1 }
 0x1d6   : > { %v847_v33 = vrot.slane %v846_v39, 1  ;;  %v1154_v36 = vsel %vm343_vm9, %v1152_v35, %v1153_v15  ;;  %v1317_v5 = vrot.slane %v1316_v30, 1  ;;  %v1146_v24 = vadd.f32 %v1144_v63, %v1136_v26 }
 0x1d7   : > { %v1016_v31 = vadd.f32 %v2406_v46, %v1012_v58  ;;  %v1300_v45 = vadd.f32 %v1298_v34, %v1290_v10  ;;  %v1197_v13 = vrot.slane %v2267_v43, 1  ;;  %v1063_v47 = vrot.slane %v2297_v12, 1 }
 0x1d8   : > { %v848_v1 = vsel %vm365_vm11, %v846_v39, %v847_v33  ;;  %v891_v44 = vrot.slane %v2275_v52, 1  ;;  %v1156_v18 = vadd.f32 %v1154_v36, %v1146_v24  ;;  %v1318_v38 = vsel %vm343_vm9, %v1316_v30, %v1317_v5  ;;  %v2704_v5 = vld [vmem:[#allocation13_spill] sm:$0xff] }
 0x1d9   : > { %v1026_v8 = vadd.f32 %v2450_v62, %v1016_v31  ;;  %v850_v46 = vadd.f32 %v848_v1, %v840_v20  ;;  %v1326_v37 = vpop.permute.xlu0 %1325  ;;  %776 = vrot.lane.b32.xlu1 %v771_v57, %s1893_s20  ;;  %v1162_v54 = vpop.permute.xlu1 %1161  ;;  %v1064_v39 = vsel %vm354_vm10, %v2297_v12, %v1063_v47  ;;  %v2702_v20 = vstv %s2347_s30 }
 0x1da   : > { %v1163_v11 = vrot.slane %v1162_v54, 1  ;;  %v1327_v62 = vrot.slane %v1326_v37, 1  ;;  %v1343_v57 = vmul.f32 %v2430_v28, %v2702_v20  ;;  %v1351_v12 = vrot.slane %v2265_v42, 1 }
 0x1db   : > { %v1036_v22 = vadd.f32 %v1034_v2, %v1026_v8  ;;  %v854_v59 = vadd.f32 %v2409_v9, %v850_v46  ;;  %v1054_v2 = vsel %vm343_vm9, %v2283_v61, %v1053_v14  ;;  %v1308_v9 = vsel %vm332_vm8, %v2482_v56, %v1307_v6  ;;  %v2703_v6 = vld [vmem:[#allocation12_spill] sm:$0xff] }
 0x1dc   : > { %v1164_v51 = vsel %vm354_vm10, %v1162_v54, %v1163_v11  ;;  %v1310_v27 = vadd.f32 %v1308_v9, %v1300_v45  ;;  %v1328_v16 = vsel %vm354_vm10, %v1326_v37, %v1327_v62  ;;  %v1207_v10 = vrot.slane %v2281_v60, 1 }
 0x1dd   : > { %v864_v0 = vadd.f32 %v2459_v25, %v854_v59  ;;  %v910_v35 = vpop.permute.xlu0 %909  ;;  %v1172_v17 = vpop.permute.xlu1 %1171  ;;  %v1046_v29 = vadd.f32 %v1044_v4, %v1036_v22  ;;  %v1166_v53 = vadd.f32 %v1164_v51, %v1156_v18  ;;  %v901_v25 = vrot.slane %v2289_v3, 1  ;;  %v2705_v59 = vld [vmem:[#allocation14_spill] sm:$0xff] }
 0x1de   : > { %v1173_v55 = vrot.slane %v1172_v17, 1  ;;  %v1320_v48 = vadd.f32 %v1318_v38, %v1310_v27  ;;  %v911_v31 = vrot.slane %v910_v35, 1  ;;  %v1198_v28 = vsel %vm321_vm7, %v2267_v43, %v1197_v13 }
 0x1df   : > { %v874_v50 = vadd.f32 %v2486_v32, %v864_v0  ;;  %v1056_v58 = vadd.f32 %v1054_v2, %v1046_v29  ;;  %v892_v32 = vsel %vm343_vm9, %v2275_v52, %v891_v44  ;;  %v902_v52 = vsel %vm354_vm10, %v2289_v3, %v901_v25 }
 0x1e0   : > { %v1174_v61 = vsel %vm365_vm11, %v1172_v17, %v1173_v55  ;;  %v1330_v14 = vadd.f32 %v1328_v16, %v1320_v48  ;;  %v1361_v36 = vrot.slane %v2703_v6, 1  ;;  %v1217_v11 = vrot.slane %v2704_v5, 1 }
 0x1e1   : > { %v884_v56 = vadd.f32 %v882_v19, %v874_v50  ;;  %v1176_v15 = vadd.f32 %v1174_v61, %v1166_v53  ;;  %v1226_v30 = vpop.permute.xlu0 %1225  ;;  %v1336_v33 = vpop.permute.xlu1 %1335  ;;  %v1066_v26 = vadd.f32 %v1064_v39, %v1056_v58  ;;  %v1188_v19 = vsel %vm310_vm6, %v2241_v23, %v1187_v41 }
 0x1e2   : > { %v1337_v4 = vrot.slane %v1336_v33, 1  ;;  %v912_v23 = vsel %vm365_vm11, %v910_v35, %v911_v31  ;;  %v1352_v3 = vsel %vm310_vm6, %v2265_v42, %v1351_v12  ;;  %v1208_v43 = vsel %vm332_vm8, %v2281_v60, %v1207_v10 }
 0x1e3   : > { %v894_v34 = vadd.f32 %v892_v32, %v884_v56  ;;  %v1180_v1 = vadd.f32 %v2433_v40, %v1176_v15  ;;  %v1371_v13 = vrot.slane %v2705_v59, 1  ;;  %v1227_v47 = vrot.slane %v1226_v30, 1 }
 0x1e4   : > { %v1338_v63 = vsel %vm365_vm11, %v1336_v33, %v1337_v4  ;;  %v1362_v42 = vsel %vm321_vm7, %v2703_v6, %v1361_v36  ;;  %v1218_v29 = vsel %vm343_vm9, %v2704_v5, %v1217_v11  ;;  %v371_v4 = vld [vmem:[#allocation2 + $0x18] ss:$8 sm:$0x3]  ;;  %v372_v12 = vstv %s2581_s7 }
 0x1e5   : > { %v904_v8 = vadd.f32 %v902_v52, %v894_v34  ;;  %v1190_v46 = vadd.f32 %v1188_v19, %v1180_v1  ;;  %v1340_v37 = vadd.f32 %v1338_v63, %v1330_v14  ;;  %v1236_v54 = vpop.permute.xlu0 %1235  ;;  %v1072_v40 = vpop.permute.xlu1 %1071  ;;  %v1372_v55 = vsel %vm332_vm8, %v2705_v59, %v1371_v13 }
 0x1e6   : > { %v1073_v41 = vrot.slane %v1072_v40, 1  ;;  %v1228_v27 = vsel %vm354_vm10, %v1226_v30, %v1227_v47  ;;  %v1237_v50 = vrot.slane %v1236_v54, 1 }
 0x1e7   : > { %v914_v45 = vadd.f32 %v912_v23, %v904_v8  ;;  %v1200_v22 = vadd.f32 %v1198_v28, %v1190_v46  ;;  %v1344_v24 = vadd.f32 %v1343_v57, %v1340_v37  ;;  %v373_v8 = vmul.f32 %v372_v12, %v371_v4  ;;  %v2706_v46 = vld [vmem:[#allocation15_spill] sm:$0xff] }
 0x1e8   : > { %v1074_v62 = vsel %vm365_vm11, %v1072_v40, %v1073_v41  ;;  %v1238_v33 = vsel %vm365_vm11, %v1236_v54, %v1237_v50 }
 0x1e9   : > { %v1210_v51 = vadd.f32 %v1208_v43, %v1200_v22  ;;  %v1354_v44 = vadd.f32 %v1352_v3, %v1344_v24  ;;  %v1076_v18 = vadd.f32 %v1074_v62, %v1066_v26  ;;  %v1400_v0 = vpop.permute.xlu0 %1399  ;;  %v1380_v35 = vpop.permute.xlu1 %1379  ;;  %v929_v17 = vrot.slane %v914_v45, %v2356_v7 }
 0x1ea   : > { %v1381_v2 = vrot.slane %v1380_v35, 1  ;;  %v925_v60 = vrot.slane %v914_v45, %v2350_v21  ;;  %v933_v56 = vrot.slane %v914_v45, %v2428_v49  ;;  %v1401_v30 = vrot.slane %v1400_v0, 1 }
 0x1eb   : > { %v1220_v9 = vadd.f32 %v1218_v29, %v1210_v51  ;;  %v1364_v38 = vadd.f32 %v1362_v42, %v1354_v44  ;;  %936 = vrot.lane.b32.xlu1 %v929_v17, %s1894_s26  ;;  %v1089_v16 = vrot.slane %v1076_v18, %v2350_v21  ;;  %v1097_v57 = vrot.slane %v1076_v18, %v2428_v49 }
 0x1ec   : > { %934 = vrot.lane.b32.xlu0 %v925_v60, %s1894_s26  ;;  %v1382_v61 = vsel %vm343_vm9, %v1380_v35, %v1381_v2  ;;  %v1093_v34 = vrot.slane %v1076_v18, %v2356_v7  ;;  %v1402_v19 = vsel %vm365_vm11, %v1400_v0, %v1401_v30 }
 0x1ed   : > { %v1230_v53 = vadd.f32 %v1228_v27, %v1220_v9  ;;  %v1374_v58 = vadd.f32 %v1372_v55, %v1364_v38  ;;  %v381_v25 = vpop.permute.xlu0 %380  ;;  %v1390_v39 = vpop.permute.xlu1 %1389 }
 0x1ee   : > { %v1391_v48 = vrot.slane %v1390_v39, 1  ;;  %v382_v10 = vrot.slane %v381_v25, 1 }
 0x1ef   : > { %v1384_v15 = vadd.f32 %v1382_v61, %v1374_v58  ;;  %1098 = vrot.lane.b32.xlu1 %v1089_v16, %s1895_s25  ;;  %v1240_v32 = vadd.f32 %v1238_v33, %v1230_v53 }
 0x1f0   : > { %v1392_v26 = vsel %vm354_vm10, %v1390_v39, %v1391_v48  ;;  %938 = vrot.lane.b32.xlu0 %v933_v56, %s1894_s26  ;;  %v383_v5 = vsel %vm310_vm6, %v381_v25, %v382_v10 }
 0x1f1   : > { %v1394_v31 = vadd.f32 %v1392_v26, %v1384_v15  ;;  %v363_v20 = vpop.permute.xlu1 %362  ;;  %v401_v1 = vpop.permute.xlu0 %400  ;;  %v1257_v63 = vrot.slane %v1240_v32, %v2356_v7  ;;  %v1253_v40 = vrot.slane %v1240_v32, %v2350_v21  ;;  %v1261_v22 = vrot.slane %v1240_v32, %v2428_v49 }
 0x1f2   : > { %v364_v14 = vrot.slane %v363_v20, 1  ;;  %v402_v11 = vrot.slane %v401_v1, 1 }
 0x1f3   : > { %1102 = vrot.lane.b32.xlu1 %v1097_v57, %s1895_s25  ;;  %v1404_v28 = vadd.f32 %v1402_v19, %v1394_v31 }
 0x1f4   : > { %v366_v52 = vsel %vm365_vm11, %v363_v20, %v364_v14  ;;  %1100 = vrot.lane.b32.xlu0 %v1093_v34, %s1895_s25  ;;  %v403_v13 = vsel %vm332_vm8, %v401_v1, %v402_v11 }
 0x1f5   : > { %v368_v37 = vadd.f32 %v366_v52, %v2706_v46  ;;  %v391_v54 = vpop.permute.xlu1 %390  ;;  %v421_v23 = vpop.permute.xlu0 %420  ;;  %v1417_v45 = vrot.slane %v1404_v28, %v2350_v21  ;;  %v1425_v44 = vrot.slane %v1404_v28, %v2428_v49  ;;  %v1421_v35 = vrot.slane %v1404_v28, %v2356_v7 }
 0x1f6   : > { %v392_v6 = vrot.slane %v391_v54, 1  ;;  %v422_v47 = vrot.slane %v421_v23, 1  ;;  %v2707_v49 = vlaneseq }
 0x1f7   : > { %v374_v36 = vadd.f32 %v373_v8, %v368_v37  ;;  %1264 = vrot.lane.b32.xlu1 %v1257_v63, %s1896_s8 }
 0x1f8   : > { %1262 = vrot.lane.b32.xlu0 %v1253_v40, %s1896_s8  ;;  %v393_v24 = vsel %vm321_vm7, %v391_v54, %v392_v6  ;;  %v423_v42 = vsel %vm354_vm10, %v421_v23, %v422_v47  ;;  %v271_v50 = vand.u32 127, %v2707_v49 }
 0x1f9   : > { %v385_v41 = vadd.f32 %v383_v5, %v374_v36  ;;  %v411_v3 = vpop.permute.xlu1 %410 }
 0x1fa   : > { %v412_v43 = vrot.slane %v411_v3, 1  ;;  %v272_v25 = vadd.s32 128, %v271_v50  ;;  %v277_v61 = vand.u32 15, %v271_v50 }
 0x1fb   : > { %v395_v59 = vadd.f32 %v393_v24, %v385_v41  ;;  %1426 = vrot.lane.b32.xlu1 %v1417_v45, %s1897_s15 }
 0x1fc   : > { %1266 = vrot.lane.b32.xlu0 %v1261_v22, %s1896_s8  ;;  %v413_v18 = vsel %vm343_vm9, %v411_v3, %v412_v43  ;;  %v284_v48 = vand.u32 15, %v272_v25  ;;  %v587_v15 = vadd.s32 4294967294, %v277_v61  ;;  %v436_v26 = vadd.s32 4294967293, %v277_v61 }
 0x1fd   : > { %v405_v62 = vadd.f32 %v403_v13, %v395_v59  ;;  %v431_v51 = vpop.permute.xlu1 %430  ;;  %v1077_v57 = vadd.s32 1, %v277_v61  ;;  %v1241_v1 = vadd.s32 2, %v277_v61  ;;  %vm1268_vm9 = vcmask 1006592  }
 0x1fe   : > { %v432_v0 = vrot.slane %v431_v51, 1  ;;  %v588_v33 = vadd.s32 4294967294, %v284_v48  ;;  %v437_v32 = vadd.s32 4294967293, %v284_v48  ;;  %v752_v20 = vadd.s32 4294967295, %v284_v48 }
 0x1ff   : > { %v415_v17 = vadd.f32 %v413_v18, %v405_v62  ;;  %1430 = vrot.lane.b32.xlu1 %v1425_v44, %s1897_s15  ;;  %vm589_vm13 = vcmp.ge.s32.totalorder %v587_v15, 0  ;;  %v1078_v14 = vadd.s32 1, %v284_v48  ;;  %vm438_vm0 = vcmp.ge.s32.totalorder %v436_v26, 0 }
 0x200   : > { %1428 = vrot.lane.b32.xlu0 %v1421_v35, %s1897_s15  ;;  %v433_v2 = vsel %vm365_vm11, %v431_v51, %v432_v0  ;;  %vm590_vm14 = vcmp.ge.s32.totalorder %v588_v33, 0  ;;  %vm439_vm1 = vcmp.ge.s32.totalorder %v437_v32, 0  ;;  %vm754_vm3 = vcmp.ge.s32.totalorder %v752_v20, 0 }
 0x201   : > { %v425_v29 = vadd.f32 %v423_v42, %v415_v17  ;;  %v1242_v46 = vadd.s32 2, %v284_v48  ;;  %vm1081_vm6 = vcmp.lt.s32.totalorder %v1077_v57, 16  ;;  %vm1082_vm7 = vcmp.lt.s32.totalorder %v1078_v14, 16 }
 0x202   : > { %vm1245_vm8 = vcmp.lt.s32.totalorder %v1241_v1, 16  ;;  %v1405_v24 = vadd.s32 3, %v277_v61  ;;  %v1406_v62 = vadd.s32 3, %v284_v48  ;;  %vm1432_vm11 = vcmask 998400  }
 0x203   : > { %v435_v60 = vadd.f32 %v433_v2, %v425_v29  ;;  %vm1246_vm10 = vcmp.lt.s32.totalorder %v1242_v46, 16 }
 0x205   : > { %v452_v9 = vrot.slane %v435_v60, %v2356_v7  ;;  %v751_v7 = vadd.s32 4294967295, %v277_v61  ;;  %v448_v19 = vrot.slane %v435_v60, %v2350_v21 }
 0x207   : > { %vm753_vm2 = vcmp.ge.s32.totalorder %v751_v7, 0  ;;  %v455_v54 = vsel %vm438_vm0, %v448_v19, 0.0  ;;  %v456_v40 = vsel %vm439_vm1, %v452_v9, 0.0 }
 0x23b   : > { %v611_v38 = vpop.permute.xlu1 %610  ;;  %v609_v55 = vpop.permute.xlu0 %608 }
 0x23c   : > { %v615_v4 = vsel %vm614_vm12, %v609_v55, %v611_v38 }
 0x23d   : > { %v619_v28 = vsel %vm589_vm13, %v615_v4, 0.0  ;;  %vm1410_vm13 = vcmp.lt.s32.totalorder %v1406_v62, 16 }
 0x23e   : > { %v621_v11 = vadd.f32 %v619_v28, %v455_v54 }
 0x23f   : > { %v613_v53 = vpop.permute.xlu0 %612 }
 0x240   : > { %v616_v12 = vsel %vm614_vm12, %v611_v38, %v613_v53  ;;  %vm1409_vm12 = vcmp.lt.s32.totalorder %v1405_v24, 16 }
 0x241   : > { %v620_v8 = vsel %vm590_vm14, %v616_v12, 0.0 }
 0x242   : > { %v622_v23 = vadd.f32 %v620_v8, %v456_v40 }
 0x247   : > { %v773_v27 = vpop.permute.xlu1 %772  ;;  %v775_v39 = vpop.permute.xlu0 %774 }
 0x248   : > { %v779_v52 = vsel %vm778_vm15, %v773_v27, %v775_v39 }
 0x249   : > { %v783_v6 = vsel %vm753_vm2, %v779_v52, 0.0 }
 0x24a   : > { %v785_v43 = vadd.f32 %v783_v6, %v621_v11 }
 0x24b   : > { %v777_v58 = vpop.permute.xlu1 %776 }
 0x24c   : > { %v780_v63 = vsel %vm778_vm15, %v775_v39, %v777_v58 }
 0x24d   : > { %v784_v36 = vsel %vm754_vm3, %v780_v63, 0.0 }
 0x24e   : > { %v786_v59 = vadd.f32 %v784_v36, %v622_v23 }
 0x25d   : > { %v937_v16 = vpop.permute.xlu1 %936 }
 0x25e   : > { %v935_v56 = vpop.permute.xlu0 %934 }
 0x25f   : > { %v941_v45 = vsel %vm940_vm4, %v935_v56, %v937_v16 }
 0x260   : > { %v947_v0 = vadd.f32 %v941_v45, %v785_v43 }
 0x261   : > { %v1099_v30 = vpop.permute.xlu1 %1098 }
 0x262   : > { %v939_v31 = vpop.permute.xlu0 %938 }
 0x263   : > { %v942_v22 = vsel %vm940_vm4, %v937_v16, %v939_v31  ;;  %v1453_v31 = vld [vmem:[%s2052_s19] sm:$0xff]  ;;  %s1815_s19 = scalar_lea.vmem %s1814_s6, 256 }
 0x264   : > { %v948_v35 = vadd.f32 %v942_v22, %v786_v59  ;;  %p1817_p3 = scmp.lt.s32.totalorder %s1815_s19, %s1809_s27 }
 0x265   : > { %v1103_v34 = vpop.permute.xlu1 %1102 }
 0x266   : > { %v1101_v10 = vpop.permute.xlu0 %1100  ;;  %p1818_p12 = por %p1817_p3, %p1816_p0 }
 0x267   : > { %v1105_v41 = vsel %vm1104_vm5, %v1099_v30, %v1101_v10  ;;  %v1106_v3 = vsel %vm1104_vm5, %v1101_v10, %v1103_v34 }
 0x268   : > { %v1109_v51 = vsel %vm1081_vm6, %v1105_v41, 0.0  ;;  %v1110_v44 = vsel %vm1082_vm7, %v1106_v3, 0.0  ;;  %p1819_p5 = pnand %p1818_p12, %p1812_p7 }
 0x269   : > { %v1265_v37 = vpop.permute.xlu1 %1264  ;;  %v1111_v2 = vadd.f32 %v1109_v51, %v947_v0  ;;  %v1112_v60 = vadd.f32 %v1110_v44, %v948_v35 }
 0x26a   : > { %v1263_v5 = vpop.permute.xlu0 %1262 }
 0x26b   : > { %v1269_v13 = vsel %vm1268_vm9, %v1263_v5, %v1265_v37 }
 0x26c   : > { %v1273_v42 = vsel %vm1245_vm8, %v1269_v13, 0.0 }
 0x26d   : > { %v1427_v47 = vpop.permute.xlu1 %1426  ;;  %v1275_v55 = vadd.f32 %v1273_v42, %v1111_v2 }
 0x26e   : > { %v1267_v18 = vpop.permute.xlu0 %1266 }
 0x26f   : > { %v1270_v17 = vsel %vm1268_vm9, %v1265_v37, %v1267_v18 }
 0x270   : > { %v1274_v29 = vsel %vm1246_vm10, %v1270_v17, 0.0 }
 0x271   : > { %v1431_v9 = vpop.permute.xlu1 %1430  ;;  %v1276_v27 = vadd.f32 %v1274_v29, %v1112_v60 }
 0x272   : > { %v1429_v38 = vpop.permute.xlu0 %1428 }
 0x273   : > { %v1433_v49 = vsel %vm1432_vm11, %v1427_v47, %v1429_v38  ;;  %v1434_v50 = vsel %vm1432_vm11, %v1429_v38, %v1431_v9 }
 0x274   : > { %v1437_v53 = vsel %vm1409_vm12, %v1433_v49, 0.0  ;;  %v1438_v58 = vsel %vm1410_vm13, %v1434_v50, 0.0 }
 0x275   : > { %v1439_v25 = vadd.f32 %v1437_v53, %v1275_v55  ;;  %v1440_v39 = vadd.f32 %v1438_v58, %v1276_v27 }
 0x277   : > { %v1673_v16 = vmul.f32 -1.442695, %v1439_v25  ;;  %v1674_v61 = vmul.f32 -1.442695, %v1440_v39 }
 0x279   : > { %1755 = vpow2.f32 %v1673_v16 }
 0x27a   : > { %1757 = vpow2.f32 %v1674_v61 }
 0x283   : > { %v1756_v48 = vpop.eup %1755 }
 0x284   : > { %v1758_v56 = vpop.eup %1757  ;;  %v1447_v15 = vadd.f32 1.0, %v1756_v48 }
 0x285   : > { %v1448_v33 = vadd.f32 1.0, %v1758_v56 }
 0x286   : > { %1759 = vrcp.f32 %v1447_v15 }
 0x287   : > { %1761 = vrcp.f32 %v1448_v33 }
 0x290   : > { %v1760_v30 = vpop.eup %1759 }
 0x291   : > { %v1762_v26 = vpop.eup %1761  ;;  %v1457_v32 = vrot.slane %v1760_v30, %v2350_v21 }
 0x292   : > { %v1461_v7 = vrot.slane %v1762_v26, %v2350_v21 }
 0x294   : > { %v1464_v20 = vcombine.low %v1457_v32, %v1461_v7 }
 0x296   : > { %v1466_v57 = vmul.f32 %v1464_v20, %v1453_v31 }
 0x298   : > { %1467 = vst [vmem:[%s173_s4] sm:$0xff] %v1466_v57 }
 0x299   : > { %1822 = shalt.err (!%p1819_p5)
}
 0x29a   : > { %s1823_s5 = scalar_lea.hbm %s2633_s22, 128  ;;  %s1827_s20 = scalar_lea.hbm %s2679_s2, 256 }
 0x29b   : > { %p1824_p10 = scmp.ne.s32.totalorder %s2633_s22, %s1823_s5  ;;  %p1828_p4 = scmp.lt.u32.totalorder %s2633_s22, %s2679_s2 }
 0x29c   : > { %p1829_p6 = scmp.lt.u32.totalorder %s1827_s20, %s1823_s5  ;;  %p1831_p9 = scmp.lt.u32.totalorder %s1823_s5, %s2633_s22 }
 0x29d   : > { %p1825_p2 = pnand %p1824_p10, %p2708_p11 }
 0x29e   : > { %p1830_p8 = por %p1829_p6, %p1828_p4 }
 0x29f   : > { %p1826_p1 = pneg %p1825_p2 }
 0x2a0   : > { %p1832_p13 = por %p1831_p9, %p1830_p8 }
 0x2a2   : > { %p1833_p7 = pnand %p1832_p13, %p1826_p1 }
 0x2a4   : > { %1836 = shalt.err (!%p1833_p7)
}
 0x2a5   : > { %1688 = dma.vmem_to_hbm [thread:$0]  (%p2708_p11), %s2635_s14, 128, %s2633_s22, %s1469_s24  }
 0x2a6 PF: > { %s1495_s25 = sand.u32 1, %s1867_s9   ;;  %p2709_p0 = scmp.ne.s32.totalorder %s2688_s16, 0 }
 0x2a7   : > { %p2710_p3 = scmp.ge.s32.totalorder %s1879_s12, 2  ;;  %s1496_s8 = scalar_lea.sflag [#allocation5], %s1495_s25 }
 0x2a9   : > { %p1699_p12 = pnand %p2710_p3, %p2709_p0 }
 0x2ab   : > { %1862 = dma.done.wait (!%p1699_p12), %s1496_s8, 128  }
 0x2ac   : > { %1864 = vsyncadd (!%p1699_p12), %s1496_s8, 4294967168  ;;  %p16_p5 = scmp.ge.s32.totalorder %s1965_s21, 4   ;;  %s2711_s9 = smov %s1871_s10 }
 0x2ad   : > { %s2712_s10 = smov %s1875_s11  ;;  %s2713_s11 = smov %s1989_s28 }
 0x2ae   : > { %s2714_s12 = smov %s1965_s21  ;;  %18 = sbr.rel (!%p16_p5) target bundleno = 6 (0x6), region = 80 }
 0x2b5   :  { %1501 = vsyncpa [#allocation4], 1 }
 0x2b6   :  { %1503 = vsyncpa [#allocation4 + $0x1], 1 }
 0x2b7   :  { %1504 = vsyncpa [#allocation5], 1 }
 0x2b8   :  { %1506 = vsyncpa [#allocation5 + $0x1], 1 }
 0x2b9   :  { %1507 = vsyncpa [#allocation6], 1 }
 0x2ba   :  { %1509 = vsyncpa [#allocation6 + $0x1], 1 }

</bundles_post_ra>
